<compile_context>
chip_gen: v5e
topology: v5e:2x2
jax: 0.10.0
libtpu: 0.0.40
codegen_flags: <defaults>
</compile_context>

<pallas_src>
import functools

import jax
import jax.numpy as jnp
from jax.experimental import pallas as pl
from jax.experimental.pallas import tpu as pltpu

# dims consistent with the module's Linear layers
VIS_HIDDEN = 768      # ViT-base hidden  (VisualEncoder.projection: 768 -> 512)
TXT_HIDDEN = 512      # T5-small hidden  (TextEncoder.projection:   512 -> 512)
PROJ_DIM   = 512
PATCH      = 16
VOCAB      = 100
INV_TEMP   = 1.0 / 0.02        # logits / 0.02  ->  logits * 50
NORM_EPS   = 1e-12             # F.normalize eps


# ----------------------------- Pallas kernels ------------------------------

def _vis_embed_pool_kernel(patches_ref, wp_ref, bp_ref, out_ref, acc_ref, *, inv_n):
    """Fused patch-embedding matmul + mean-pool over patches.

    patches: [1, TN, K] (bf16)   wp: [K, D] (bf16)   bp: [1, D] (f32)
    out:     [1, 1, D]  (f32)    acc scratch: [1, D] (f32), resident across N axis.
    """
    n = pl.program_id(1)

    @pl.when(n == 0)
    def _init():
        acc_ref[...] = jnp.zeros_like(acc_ref)

    # bf16 x bf16 -> f32 accumulate on the MXU; sum-over-patches on the XLU.
    emb = jnp.dot(patches_ref[0], wp_ref[...], preferred_element_type=jnp.float32)
    acc_ref[...] += jnp.sum(emb, axis=0, keepdims=True)

    @pl.when(n == pl.num_programs(1) - 1)
    def _finalize():
        # mean over the *true* patch count (zero-padded tiles contribute 0),
        # conv bias added once (mean(x_i@W + b) == mean(x_i@W) + b).
        out_ref[0] = acc_ref[...] * inv_n + bp_ref[...]


def _clip_head_kernel(vis_cls_ref, txt_hid_ref, wv_ref, bv_ref,
                      wt_ref, bt_ref, logits_ref):
    """Text mean-pool + both projections + L2 normalize + cosine sim + temperature."""
    # visual projection 768 -> 512
    vis = jnp.dot(vis_cls_ref[...], wv_ref[...],
                  preferred_element_type=jnp.float32) + bv_ref[...]          # [B, 512]
    # text: last_hidden.mean(dim=1), then projection 512 -> 512
    pooled = jnp.mean(txt_hid_ref[...], axis=1)                              # [T, 512]
    txt = jnp.dot(pooled, wt_ref[...],
                  preferred_element_type=jnp.float32) + bt_ref[...]          # [T, 512]
    # F.normalize(x, dim=-1): x / max(||x||, eps)  ==  x * rsqrt(max(sumsq, eps^2))
    vis_n = vis * jax.lax.rsqrt(
        jnp.maximum(jnp.sum(vis * vis, axis=-1, keepdims=True), NORM_EPS * NORM_EPS))
    txt_n = txt * jax.lax.rsqrt(
        jnp.maximum(jnp.sum(txt * txt, axis=-1, keepdims=True), NORM_EPS * NORM_EPS))
    # cosine similarity: contract last dims (avoids explicit transpose of txt_n)
    logits = jax.lax.dot_general(vis_n, txt_n,
                                 dimension_numbers=(((1,), (1,)), ((), ())),
                                 preferred_element_type=jnp.float32)         # [B, T]
    logits_ref[...] = logits * INV_TEMP


# ------------------------------ wrappers ------------------------------------

def visual_embed_pool(patches, wp_bf16, bp, n_patches, *, tn=512):
    """patches: [B, Npad, K] bf16 (Npad % tile == 0), returns mean patch embedding [B, D] f32."""
    B, n_pad, K = patches.shape
    D = wp_bf16.shape[1]
    if n_pad <= tn:
        tn = n_pad                      # whole (small) patch axis in one tile
    assert n_pad % tn == 0, (n_pad, tn)
    grid = (B, n_pad // tn)

    flops = 2 * B * n_pad * K * D
    bytes_accessed = int(patches.size * patches.dtype.itemsize
                         + wp_bf16.size * wp_bf16.dtype.itemsize
                         + bp.size * bp.dtype.itemsize
                         + B * D * 4)

    out = pl.pallas_call(
        functools.partial(_vis_embed_pool_kernel, inv_n=1.0 / float(n_patches)),
        out_shape=jax.ShapeDtypeStruct((B, 1, D), jnp.float32),
        grid=grid,
        in_specs=[
            pl.BlockSpec((1, tn, K), lambda b, n: (b, n, 0)),   # patch tiles, pipelined
            pl.BlockSpec((K, D),     lambda b, n: (0, 0)),      # weight resident in VMEM
            pl.BlockSpec((1, D),     lambda b, n: (0, 0)),      # bias resident in VMEM
        ],
        out_specs=pl.BlockSpec((1, 1, D), lambda b, n: (b, 0, 0)),  # accumulator block
        scratch_shapes=[pltpu.VMEM((1, D), jnp.float32)],
        compiler_params=pltpu.CompilerParams(
            dimension_semantics=("parallel", "arbitrary"),   # batch across TCs, N = reduction
            vmem_limit_bytes=32 * 1024 * 1024,               # explicit budget (v7x headroom)
        ),
        cost_estimate=pl.CostEstimate(flops=flops, transcendentals=0,
                                      bytes_accessed=bytes_accessed),
    )(patches, wp_bf16, bp)
    return out.reshape(B, D)


def clip_head(vis_cls, txt_hidden, params):
    """Tiny fused head; whole-array blocks (block_shape == full dims, all shapes small)."""
    B = vis_cls.shape[0]
    T = txt_hidden.shape[0]
    return pl.pallas_call(
        _clip_head_kernel,
        out_shape=jax.ShapeDtypeStruct((B, T), jnp.float32),
        grid=(1,),
        in_specs=[
            pl.BlockSpec(vis_cls.shape,        lambda i: (0, 0)),
            pl.BlockSpec(txt_hidden.shape,     lambda i: (0, 0, 0)),
            pl.BlockSpec(params["wv"].shape,   lambda i: (0, 0)),
            pl.BlockSpec(params["bv"].shape,   lambda i: (0, 0)),
            pl.BlockSpec(params["wt"].shape,   lambda i: (0, 0)),
            pl.BlockSpec(params["bt"].shape,   lambda i: (0, 0)),
        ],
        out_specs=pl.BlockSpec((B, T), lambda i: (0, 0)),
        compiler_params=pltpu.CompilerParams(dimension_semantics=("arbitrary",)),
    )(vis_cls, txt_hidden,
      params["wv"], params["bv"], params["wt"], params["bt"])


def patchify_nchw(images, patch, out_dtype=jnp.bfloat16):
    """NCHW -> [B, N, C*P*P] (C-major within each patch, matching Conv2d weight layout).

    Cast to bf16 here so the materialized patch copy / HBM->VMEM DMA is half-width.
    """
    B, C, H, W = images.shape
    nh, nw = H // patch, W // patch
    x = images.reshape(B, C, nh, patch, nw, patch)
    x = x.transpose(0, 2, 4, 1, 3, 5)                 # [B, nh, nw, C, P, P]
    x = x.reshape(B, nh * nw, C * patch * patch)
    return x.astype(out_dtype)


def _pad_patch_axis(patches, tn):
    """Zero-pad the patch axis to a tile multiple (zeros contribute 0 to the pooled sum)."""
    B, N, K = patches.shape
    if N <= tn:
        return patches
    n_pad = ((N + tn - 1) // tn) * tn
    if n_pad == N:
        return patches
    return jnp.pad(patches, ((0, 0), (0, n_pad - N), (0, 0)))


def init_params(key):
    ks = jax.random.split(key, 7)
    return {
        "wp":  jax.random.normal(ks[0], (3 * PATCH * PATCH, VIS_HIDDEN), jnp.float32) * 0.02,
        "bp":  jax.random.normal(ks[1], (1, VIS_HIDDEN), jnp.float32) * 0.02,
        "wv":  jax.random.normal(ks[2], (VIS_HIDDEN, PROJ_DIM), jnp.float32) * 0.02,
        "bv":  jax.random.normal(ks[3], (1, PROJ_DIM), jnp.float32) * 0.02,
        "wt":  jax.random.normal(ks[4], (TXT_HIDDEN, PROJ_DIM), jnp.float32) * 0.02,
        "bt":  jax.random.normal(ks[5], (1, PROJ_DIM), jnp.float32) * 0.02,
        "emb": jax.random.normal(ks[6], (VOCAB, TXT_HIDDEN), jnp.float32) * 0.02,
    }


def clip_forward(images, token_ids, params, *, tn=512):
    # ---- visual path (frozen ViT backbone stand-in) ----
    patches = patchify_nchw(images, PATCH)                 # [B, N, C*P*P] bf16
    n_patches = patches.shape[1]
    patches = _pad_patch_axis(patches, tn)
    wp_bf16 = params["wp"].astype(jnp.bfloat16)            # bf16 MXU input, f32 accumulate
    # TODO(synk): pretrained ViT transformer stack + learned CLS token are a frozen
    # HF checkpoint with no in-script equivalent; stand-in mean-pools patch embeddings.
    vis_cls = visual_embed_pool(patches, wp_bf16, params["bp"], n_patches, tn=tn)  # [B, 768]

    # ---- text path (frozen T5 encoder stand-in) ----
    # TODO(synk): T5Tokenizer + pretrained T5 encoder are untranslatable; stand-in
    # produces last_hidden_state via a deterministic embedding lookup.
    txt_hidden = params["emb"][token_ids]                  # [T, S, 512]

    # ---- CLIP head (mean-pool, projections, normalize, cosine sim, /0.02) ----
    return clip_head(vis_cls, txt_hidden, params)          # [B, T]


if __name__ == "__main__":
    key = jax.random.PRNGKey(0)
    k_img, k_tok, k_par = jax.random.split(key, 3)

    B, C, H, W = 2, 3, 32, 32          # small images, NCHW like PyTorch
    T, S = 3, 8                        # 3 texts, seq len 8

    images = jax.random.normal(k_img, (B, C, H, W), jnp.float32)
    token_ids = jax.random.randint(k_tok, (T, S), 0, VOCAB)
    params = init_params(k_par)

    logits = clip_forward(images, token_ids, params)
    logits = jax.block_until_ready(logits)
    assert logits.shape == (B, T), logits.shape
    assert logits.dtype == jnp.float32
    print("KERNEL_OK")
</pallas_src>

<mosaic_0001>
module attributes {stable_mosaic.version = 11 : i64} {
  func.func @_vis_embed_pool_kernel(%arg0: i32, %arg1: i32, %arg2: memref<1x4x768xbf16, #tpu.memory_space<vmem>>, %arg3: memref<768x768xbf16, #tpu.memory_space<vmem>>, %arg4: memref<1x768xf32, #tpu.memory_space<vmem>>, %arg5: memref<1x1x768xf32, #tpu.memory_space<vmem>>, %arg6: memref<1x768xf32, #tpu.memory_space<vmem>>) attributes {dimension_semantics = [#tpu.dimension_semantics<parallel>, #tpu.dimension_semantics<arbitrary>], iteration_bounds = array<i64: 2, 1>, scalar_prefetch = 0 : i64, scratch_operands = 1 : i64, tpu.core_type = #tpu.core_type<tc>, window_params = [{transform_indices = @transform_0, window_bounds = array<i64: 1, 4, 768>}, {pipeline_mode = #tpu.pipeline_mode<synchronous>, transform_indices = @transform_1, window_bounds = array<i64: 768, 768>}, {pipeline_mode = #tpu.pipeline_mode<synchronous>, transform_indices = @transform_2, window_bounds = array<i64: 1, 768>}, {transform_indices = @transform_3, window_bounds = array<i64: 1, 1, 768>}]} {
    %c0_i32 = arith.constant 0 : i32
    %0 = arith.cmpi eq, %arg1, %c0_i32 : i32
    %1 = arith.extui %0 : i1 to i32
    %c0_i32_0 = arith.constant 0 : i32
    %2 = arith.cmpi ne, %1, %c0_i32_0 : i32
    scf.if %2 {
      %cst_12 = arith.constant 0.000000e+00 : f32
      %15 = vector.broadcast %cst_12 : f32 to vector<1x768xf32>
      %c0_13 = arith.constant 0 : index
      %c0_14 = arith.constant 0 : index
      %16 = vector.load %arg6[%c0_13, %c0_14] : memref<1x768xf32, #tpu.memory_space<vmem>>, vector<1x768xf32>
      tpu.vector_store %arg6[%c0_13, %c0_14], %15 {strides = array<i32>} : memref<1x768xf32, #tpu.memory_space<vmem>>, vector<1x768xf32>,
    } else {
    }
    %c0 = arith.constant 0 : index
    %c0_1 = arith.constant 0 : index
    %c0_2 = arith.constant 0 : index
    %3 = vector.load %arg2[%c0, %c0_1, %c0_2] : memref<1x4x768xbf16, #tpu.memory_space<vmem>>, vector<1x4x768xbf16>
    %4 = vector.shape_cast %3 : vector<1x4x768xbf16> to vector<4x768xbf16>
    %c0_3 = arith.constant 0 : index
    %c0_4 = arith.constant 0 : index
    %5 = vector.load %arg3[%c0_3, %c0_4] : memref<768x768xbf16, #tpu.memory_space<vmem>>, vector<768x768xbf16>
    %cst = arith.constant dense<0.000000e+00> : vector<4x768xf32>
    %6 = tpu.matmul %4, %5, %cst {dimension_numbers = #tpu.dot_dimension_numbers<[1], [0], [0], [1], [0, 0, 1, 1], [], []>} : vector<4x768xbf16>, vector<768x768xbf16>, vector<4x768xf32> -> vector<4x768xf32>
    %c0_5 = arith.constant 0 : index
    %c0_6 = arith.constant 0 : index
    %7 = vector.load %arg6[%c0_5, %c0_6] : memref<1x768xf32, #tpu.memory_space<vmem>>, vector<1x768xf32>
    %cst_7 = arith.constant dense<0.000000e+00> : vector<768xf32>
    %8 = vector.multi_reduction <add>, %6, %cst_7 [0] : vector<4x768xf32> to vector<768xf32>
    %9 = vector.shape_cast %8 : vector<768xf32> to vector<1x768xf32>
    %10 = arith.addf %7, %9 : vector<1x768xf32>
    %c0_8 = arith.constant 0 : index
    %c0_9 = arith.constant 0 : index
    %11 = vector.load %arg6[%c0_8, %c0_9] : memref<1x768xf32, #tpu.memory_space<vmem>>, vector<1x768xf32>
    tpu.vector_store %arg6[%c0_8, %c0_9], %10 {strides = array<i32>} : memref<1x768xf32, #tpu.memory_space<vmem>>, vector<1x768xf32>,
    %c0_i32_10 = arith.constant 0 : i32
    %12 = arith.cmpi eq, %arg1, %c0_i32_10 : i32
    %13 = arith.extui %12 : i1 to i32
    %c0_i32_11 = arith.constant 0 : i32
    %14 = arith.cmpi ne, %13, %c0_i32_11 : i32
    scf.if %14 {
      %c0_12 = arith.constant 0 : index
      %c0_13 = arith.constant 0 : index
      %15 = vector.load %arg6[%c0_12, %c0_13] : memref<1x768xf32, #tpu.memory_space<vmem>>, vector<1x768xf32>
      %cst_14 = arith.constant 2.500000e-01 : f32
      %16 = vector.broadcast %cst_14 : f32 to vector<1x768xf32>
      %17 = arith.mulf %15, %16 : vector<1x768xf32>
      %c0_15 = arith.constant 0 : index
      %c0_16 = arith.constant 0 : index
      %18 = vector.load %arg4[%c0_15, %c0_16] : memref<1x768xf32, #tpu.memory_space<vmem>>, vector<1x768xf32>
      %19 = arith.addf %17, %18 : vector<1x768xf32>
      %c0_17 = arith.constant 0 : index
      %c0_18 = arith.constant 0 : index
      %c0_19 = arith.constant 0 : index
      %20 = vector.load %arg5[%c0_17, %c0_18, %c0_19] : memref<1x1x768xf32, #tpu.memory_space<vmem>>, vector<1x1x768xf32>
      %21 = vector.shape_cast %20 : vector<1x1x768xf32> to vector<1x768xf32>
      %22 = vector.shape_cast %19 : vector<1x768xf32> to vector<1x1x768xf32>
      tpu.vector_store %arg5[%c0_17, %c0_18, %c0_19], %22 {strides = array<i32>} : memref<1x1x768xf32, #tpu.memory_space<vmem>>, vector<1x1x768xf32>,
    } else {
    }
    return
  }
  func.func @transform_0(%arg0: i32, %arg1: i32) -> (i32, i32, i32) {
    %c0_i32 = arith.constant 0 : i32
    %c0_i32_0 = arith.constant 0 : i32
    return %arg0, %arg1, %c0_i32 : i32, i32, i32
  }
  func.func @transform_1(%arg0: i32, %arg1: i32) -> (i32, i32) {
    %c0_i32 = arith.constant 0 : i32
    %c0_i32_0 = arith.constant 0 : i32
    %c0_i32_1 = arith.constant 0 : i32
    return %c0_i32, %c0_i32_0 : i32, i32
  }
  func.func @transform_2(%arg0: i32, %arg1: i32) -> (i32, i32) {
    %c0_i32 = arith.constant 0 : i32
    %c0_i32_0 = arith.constant 0 : i32
    %c0_i32_1 = arith.constant 0 : i32
    return %c0_i32, %c0_i32_0 : i32, i32
  }
  func.func @transform_3(%arg0: i32, %arg1: i32) -> (i32, i32, i32) {
    %c0_i32 = arith.constant 0 : i32
    %c0_i32_0 = arith.constant 0 : i32
    %c0_i32_1 = arith.constant 0 : i32
    return %arg0, %c0_i32, %c0_i32_0 : i32, i32, i32
  }
}

</mosaic_0001>

<bundles_post_ra>
// kernel: tpu_custom_call.1
= control target key start
LH: loop header
LB: loop body
LE: loop exit
PB: predicated region body
PF: predicated region fallthrough
CT: control target
= control target key end

     0   :  { %8 = vsyncpa [#allocation4], 0  ;;  %s4655_s0 = inlined_call_operand.hbm [shape: bf16[2,4,768], index: 0, kind: input, shape index: {}]   ;;  %s4656_s1 = inlined_call_operand.hbm [shape: bf16[768,768], index: 1, kind: input, shape index: {}]   ;;  %s4657_s2 = inlined_call_operand.hbm [shape: f32[1,768], index: 2, kind: input, shape index: {}]   ;;  %s4658_s3 = inlined_call_operand.hbm [shape: f32[2,1,768], index: 3, kind: output, shape index: {}]  }
   0x1   :  { %10 = vsyncpa [#allocation4 + $0x1], 0 }
   0x2   :  { %11 = vsyncpa [#allocation7], 0 }
   0x3   :  { %12 = vsyncpa [#allocation5], 0 }
   0x4   :  { %14 = vsyncpa [#allocation5 + $0x1], 0  ;;  %s4408_s12 = smov 0   ;;  %s4410_s13 = smov 0  }
   0x5   :  { %s4412_s14 = smov 0   ;;  %s4414_s15 = smov 0  }
   0x6   :  { %s4416_s16 = smov 0   ;;  %s4418_s17 = smov 0  }
   0x7 LB: > { %s2656_s18 = sadd.s32 4294967295, %s4381_s17   ;;  %p2658_p0 = scmp.ge.s32.totalorder %s4381_s17, 1  ;;  %s4381_s17 = sphi %s4418_s17, %s20_s17   ;;  %s4377_s16 = sphi %s4416_s16, %s4671_s16   ;;  %s4373_s15 = sphi %s4414_s15, %s4670_s15   ;;  %s4369_s14 = sphi %s4412_s14, %s4669_s14   ;;  %s4365_s13 = sphi %s4410_s13, %s4668_s13   ;;  %s4361_s12 = sphi %s4408_s12, %s4667_s12  }
   0x8   : > { %p4442_p1 = scmp.eq.s32.totalorder %s2656_s18, 0  ;;  %p133_p2 = scmp.lt.s32.totalorder %s4381_s17, 3 }
   0x9   : > { %s144_s22 = sshll.u32 %s4656_s1, 4  ;;  %s4383_s24 = smov [#allocation6]   ;;  %s145_s22 = int_to_ptr.hbm [resolvable:$true] %s144_s22 }
   0xa   : > { %p4450_p3 = pnand %p2658_p0, %p133_p2  ;;  %s146_s25 = sshll.u32 %s4383_s24, 4  ;;  %s147_s25 = int_to_ptr.vmem [resolvable:$true] %s146_s25 }
   0xb   : > { %p2661_p6 = scmp.ge.s32.totalorder %s4381_s17, 2  ;;  %s159_s28 = sshll.u32 %s4657_s2, 4  ;;  %s160_s28 = int_to_ptr.hbm [resolvable:$true] %s159_s28 }
   0xc   : > { %p4125_p4 = pneg %p4450_p3  ;;  %s4384_s29 = smov 384  }
   0xd   : > { %s4385_s30 = smov 24   ;;  %s4386_s4 = smov [#allocation8]  }
   0xe   : > { %p4126_p5 = pnand %p4125_p4, %p4442_p1  ;;  %s161_s5 = sshll.u32 %s4386_s4, 4  ;;  %s162_s5 = int_to_ptr.vmem [resolvable:$true] %s161_s5 }
   0xf   : > { %s2657_s6 = sadd.s32 4294967294, %s4381_s17   ;;  %s32_s7 = sadd.s32 1, %s4377_s16 }
  0x10   : > { %4128 = dma.hbm_to_vmem [thread:$0]  (!%p4126_p5), %s145_s22, 36864, %s147_s25, [#allocation7], %s4384_s29, %s4384_s29, %s4385_s30  }
  0x11   : > { %4131 = dma.hbm_to_vmem [thread:$0]  (!%p4126_p5), %s160_s28, 96, %s162_s5, [#allocation7]  }
  0x12   : > { %p34_p7 = scmp.ge.s32.totalorder %s32_s7, 2  ;;  %s41_s8 = sadd.s32 1, %s4369_s14 }
  0x13   : > { %p48_p8 = scmp.ne.s32.totalorder %s4369_s14, %s4365_s13  ;;  %p49_p9 = scmp.eq.s32.totalorder %s4381_s17, 0 }
  0x14   : > { %s4673_s7 = smov (%p34_p7, %s32_s7), 0  ;;  %p54_p11 = scmp.ne.s32.totalorder %s4365_s13, %s4361_s12 }
  0x15   : > { %p4470_p10 = por %p49_p9, %p48_p8  ;;  %s36_s10 = ssub.s32 %s4377_s16, %s4673_s7 }
  0x16   : > { %p120_p12 = scmp.eq.s32.totalorder %s2656_s18, 1  ;;  %p39_p13 = scmp.eq.s32.totalorder %s36_s10, 0 }
  0x17   : > { %p4482_p0 = por %p4442_p1, %p54_p11  ;;  %p126_p4 = scmp.eq.s32.totalorder %s2657_s6, 1 }
  0x18   : > { %p4486_p2 = por %p120_p12, %p48_p8  ;;  %p4142_p7 = scmp.lt.s32.totalorder %s4381_s17, 2 }
  0x19   : > { %s4491_s21 = scalar_select %p39_p13, %s4369_s14, %s41_s8  }
  0x1a   : > { %p4493_p5 = por %p126_p4, %p54_p11  ;;  %s172_s24 = sand.u32 1, %s4369_s14  }
  0x1b   : > { %s4109_s18 = smul.u32 12, %s4377_s16  ;;  %p4133_p8 = pnand %p4142_p7, %p4470_p10 }
  0x1c   : > { %s4108_s25 = smul.u32 12, %s172_s24  ;;  %s173_s5 = scalar_lea.sflag [#allocation4], %s172_s24 }
  0x1d   : > { %s183_s28 = scalar_lea.hbm %s4655_s0, %s4109_s18  ;;  %196 = sbr.rel (%p4450_p3) target bundleno = 501 (0x1f5), region = 32 }
  0x1e   : > { %s185_s29 = sshll.u32 %s183_s28, 4  ;;  %s176_s30 = scalar_lea.vmem [#allocation3], %s4108_s25  ;;  %s186_s29 = int_to_ptr.hbm [resolvable:$true] %s185_s29 }
  0x1f   : > { %s187_s4 = sshll.u32 %s176_s30, 4  ;;  %s4508_s6 = sand.u32 (!%p4450_p3), 1, %s4365_s13   ;;  %s188_s4 = int_to_ptr.vmem [resolvable:$true] %s187_s4 }
  0x20   : > { %4135 = dma.hbm_to_vmem [thread:$0]  (!%p4133_p8), %s186_s29, 192, %s188_s4, %s173_s5  }
  0x21   : > { %s4110_s8 = smul.u32 (!%p4450_p3), 12, %s4508_s6  ;;  %s199_s10 = scalar_lea.sflag (!%p4450_p3), [#allocation4], %s4508_s6 }
  0x23   : > { %s4512_s9 = scalar_lea.vmem [#allocation3], %s4110_s8 }
  0x24   : > { %4348 = dma.done.wait (%p4482_p0), %s199_s10, 192  }
  0x25   : > { %4350 = vsyncadd (%p4482_p0), %s199_s10, 4294967104 }
  0x26   : > { %4352 = dma.done.wait (%p4442_p1), [#allocation7], 36960  }
  0x27   : > { %4354 = vsyncadd (%p4442_p1), [#allocation7], 4294930336  ;;  %v2836_v0 = vld [vmem:[#allocation6 + $0x150] sm:$0xf]  ;;  %v3865_v1 = vld [vmem:[#allocation6 + $0x164] sm:$0xf0] }
  0x28   : > { %v3028_v2 = vld [vmem:[#allocation6 + $0x2d0] sm:$0xf]  ;;  %v2837_v3 = vor.u32 %v3865_v1, %v2836_v0  ;;  %v3913_v4 = vld [vmem:[#allocation6 + $0x2e4] sm:$0xf0]  ;;  %v2812_v11 = vld [vmem:[#allocation6 + $0x120] sm:$0xf] }
  0x29   : > { %v3220_v5 = vld [vmem:[#allocation6 + $0x450] sm:$0xf]  ;;  %v3961_v6 = vld [vmem:[#allocation6 + $0x464] sm:$0xf0]  ;;  %v3029_v7 = vor.u32 %v3913_v4, %v3028_v2  ;;  %v3859_v13 = vld [vmem:[#allocation6 + $0x134] sm:$0xf0] }
  0x2a   : > { %v3221_v8 = vor.u32 %v3961_v6, %v3220_v5  ;;  %v3412_v9 = vld [vmem:[#allocation6 + $0x5d0] sm:$0xf]  ;;  %v4009_v10 = vld [vmem:[#allocation6 + $0x5e4] sm:$0xf0]  ;;  %1992 = vmatpush.bf16.msra.mxu0 %v2837_v3  ;;  %v3004_v14 = vld [vmem:[#allocation6 + $0x2a0] sm:$0xf]  ;;  %v2813_v16 = vor.u32 %v3859_v13, %v2812_v11 }
  0x2b   : > { %v3413_v12 = vor.u32 %v4009_v10, %v3412_v9  ;;  %v3907_v15 = vld [vmem:[#allocation6 + $0x2b4] sm:$0xf0]  ;;  %2005 = vmatpush.bf16.msra.mxu1 %v3029_v7  ;;  %v3196_v18 = vld [vmem:[#allocation6 + $0x420] sm:$0xf]  ;;  %v2788_v23 = vld [vmem:[#allocation6 + $0xf0] sm:$0xf] }
  0x2c   : > { %2018 = vmatpush.bf16.msra.mxu2 %v3221_v8  ;;  %v3005_v17 = vor.u32 %v3907_v15, %v3004_v14  ;;  %v3955_v19 = vld [vmem:[#allocation6 + $0x434] sm:$0xf0]  ;;  %v3388_v20 = vld [vmem:[#allocation6 + $0x5a0] sm:$0xf]  ;;  %v3853_v24 = vld [vmem:[#allocation6 + $0x104] sm:$0xf0] }
  0x2d   : > { %2031 = vmatpush.bf16.msra.mxu3 %v3413_v12  ;;  %v3197_v21 = vor.u32 %v3955_v19, %v3196_v18  ;;  %v4003_v22 = vld [vmem:[#allocation6 + $0x5b4] sm:$0xf0]  ;;  %v2980_v26 = vld [vmem:[#allocation6 + $0x270] sm:$0xf]  ;;  %v3901_v27 = vld [vmem:[#allocation6 + $0x284] sm:$0xf0]  ;;  %v2789_v29 = vor.u32 %v3853_v24, %v2788_v23 }
  0x2e   : > { %v3389_v25 = vor.u32 %v4003_v22, %v3388_v20  ;;  %v3172_v28 = vld [vmem:[#allocation6 + $0x3f0] sm:$0xf]  ;;  %1993 = vmatpush.bf16.msra.mxu0 %v2813_v16  ;;  %v3949_v30 = vld [vmem:[#allocation6 + $0x404] sm:$0xf0]  ;;  %v2981_v33 = vor.u32 %v3901_v27, %v2980_v26  ;;  %v2764_v35 = vld [vmem:[#allocation6 + $0xc0] sm:$0xf] }
  0x2f   : > { %v3364_v31 = vld [vmem:[#allocation6 + $0x570] sm:$0xf]  ;;  %v3997_v32 = vld [vmem:[#allocation6 + $0x584] sm:$0xf0]  ;;  %2006 = vmatpush.bf16.msra.mxu1 %v3005_v17  ;;  %v3173_v34 = vor.u32 %v3949_v30, %v3172_v28  ;;  %v3847_v36 = vld [vmem:[#allocation6 + $0xd4] sm:$0xf0] }
  0x30   : > { %2019 = vmatpush.bf16.msra.mxu2 %v3197_v21  ;;  %v2956_v37 = vld [vmem:[#allocation6 + $0x240] sm:$0xf]  ;;  %v3365_v38 = vor.u32 %v3997_v32, %v3364_v31  ;;  %v3895_v39 = vld [vmem:[#allocation6 + $0x254] sm:$0xf0]  ;;  %v2765_v44 = vor.u32 %v3847_v36, %v2764_v35  ;;  %v2740_v47 = vld [vmem:[#allocation6 + $0x90] sm:$0xf] }
  0x31   : > { %2032 = vmatpush.bf16.msra.mxu3 %v3389_v25  ;;  %v3148_v40 = vld [vmem:[#allocation6 + $0x3c0] sm:$0xf]  ;;  %v3943_v41 = vld [vmem:[#allocation6 + $0x3d4] sm:$0xf0]  ;;  %v2957_v45 = vor.u32 %v3895_v39, %v2956_v37  ;;  %v3841_v48 = vld [vmem:[#allocation6 + $0xa4] sm:$0xf0] }
  0x32   : > { %v3340_v42 = vld [vmem:[#allocation6 + $0x540] sm:$0xf]  ;;  %v3991_v43 = vld [vmem:[#allocation6 + $0x554] sm:$0xf0]  ;;  %1994 = vmatpush.bf16.msra.mxu0 %v2789_v29  ;;  %v3149_v46 = vor.u32 %v3943_v41, %v3148_v40  ;;  %v2932_v49 = vld [vmem:[#allocation6 + $0x210] sm:$0xf]  ;;  %v2741_v56 = vor.u32 %v3841_v48, %v2740_v47 }
  0x33   : > { %2007 = vmatpush.bf16.msra.mxu1 %v2981_v33  ;;  %v3341_v50 = vor.u32 %v3991_v43, %v3340_v42  ;;  %v3889_v51 = vld [vmem:[#allocation6 + $0x224] sm:$0xf0]  ;;  %v3124_v52 = vld [vmem:[#allocation6 + $0x390] sm:$0xf]  ;;  %v2716_v59 = vld [vmem:[#allocation6 + $0x60] sm:$0xf] }
  0x34   : > { %2020 = vmatpush.bf16.msra.mxu2 %v3173_v34  ;;  %v3937_v53 = vld [vmem:[#allocation6 + $0x3a4] sm:$0xf0]  ;;  %v3316_v54 = vld [vmem:[#allocation6 + $0x510] sm:$0xf]  ;;  %v2933_v57 = vor.u32 %v3889_v51, %v2932_v49  ;;  %v3835_v60 = vld [vmem:[#allocation6 + $0x74] sm:$0xf0] }
  0x35   : > { %2033 = vmatpush.bf16.msra.mxu3 %v3365_v38  ;;  %v3985_v55 = vld [vmem:[#allocation6 + $0x524] sm:$0xf0]  ;;  %v3125_v58 = vor.u32 %v3937_v53, %v3124_v52  ;;  %v2908_v61 = vld [vmem:[#allocation6 + $0x1e0] sm:$0xf]  ;;  %v3883_v63 = vld [vmem:[#allocation6 + $0x1f4] sm:$0xf0]  ;;  %v2717_v4 = vor.u32 %v3835_v60, %v2716_v59 }
  0x36   : > { %1995 = vmatpush.bf16.msra.mxu0 %v2765_v44  ;;  %v3317_v62 = vor.u32 %v3985_v55, %v3316_v54  ;;  %v3100_v0 = vld [vmem:[#allocation6 + $0x360] sm:$0xf]  ;;  %v3931_v1 = vld [vmem:[#allocation6 + $0x374] sm:$0xf0]  ;;  %v2909_v5 = vor.u32 %v3883_v63, %v2908_v61  ;;  %v2692_v7 = vld [vmem:[#allocation6 + $0x30] sm:$0xf] }
  0x37   : > { %2008 = vmatpush.bf16.msra.mxu1 %v2957_v45  ;;  %v3292_v2 = vld [vmem:[#allocation6 + $0x4e0] sm:$0xf]  ;;  %v3979_v3 = vld [vmem:[#allocation6 + $0x4f4] sm:$0xf0]  ;;  %v3101_v6 = vor.u32 %v3931_v1, %v3100_v0  ;;  %v3829_v8 = vld [vmem:[#allocation6 + $0x44] sm:$0xf0] }
  0x38   : > { %2021 = vmatpush.bf16.msra.mxu2 %v3149_v46  ;;  %v2884_v9 = vld [vmem:[#allocation6 + $0x1b0] sm:$0xf]  ;;  %v3293_v10 = vor.u32 %v3979_v3, %v3292_v2  ;;  %v3877_v11 = vld [vmem:[#allocation6 + $0x1c4] sm:$0xf0]  ;;  %v2693_v16 = vor.u32 %v3829_v8, %v2692_v7  ;;  %v2668_v17 = vld [vmem:[#allocation6] sm:$0xf] }
  0x39   : > { %2034 = vmatpush.bf16.msra.mxu3 %v3341_v50  ;;  %v3076_v12 = vld [vmem:[#allocation6 + $0x330] sm:$0xf]  ;;  %v3925_v13 = vld [vmem:[#allocation6 + $0x344] sm:$0xf0]  ;;  %v3823_v18 = vld [vmem:[#allocation6 + $0x14] sm:$0xf0]  ;;  %v2885_v19 = vor.u32 %v3877_v11, %v2884_v9 }
  0x3a   : > { %1996 = vmatpush.bf16.msra.mxu0 %v2741_v56  ;;  %v3268_v14 = vld [vmem:[#allocation6 + $0x4b0] sm:$0xf]  ;;  %v3973_v15 = vld [vmem:[#allocation6 + $0x4c4] sm:$0xf0]  ;;  %v3077_v20 = vor.u32 %v3925_v13, %v3076_v12  ;;  %v2860_v21 = vld [vmem:[#allocation6 + $0x180] sm:$0xf]  ;;  %v2669_v31 = vor.u32 %v3823_v18, %v2668_v17 }
  0x3b   : > { %2009 = vmatpush.bf16.msra.mxu1 %v2933_v57  ;;  %v3871_v22 = vld [vmem:[#allocation6 + $0x194] sm:$0xf0]  ;;  %v3052_v23 = vld [vmem:[#allocation6 + $0x300] sm:$0xf]  ;;  %v3269_v24 = vor.u32 %v3973_v15, %v3268_v14  ;;  %v3604_v28 = vld [vmem:[#allocation6 + $0x750] sm:$0xf] }
  0x3c   : > { %2022 = vmatpush.bf16.msra.mxu2 %v3125_v58  ;;  %v3919_v25 = vld [vmem:[#allocation6 + $0x314] sm:$0xf0]  ;;  %v3244_v26 = vld [vmem:[#allocation6 + $0x480] sm:$0xf]  ;;  %v4057_v29 = vld [vmem:[#allocation6 + $0x764] sm:$0xf0]  ;;  %v2861_v35 = vor.u32 %v3871_v22, %v2860_v21 }
  0x3d   : > { %2035 = vmatpush.bf16.msra.mxu3 %v3317_v62  ;;  %v3967_v27 = vld [vmem:[#allocation6 + $0x494] sm:$0xf0]  ;;  %v3796_v30 = vld [vmem:[#allocation6 + $0x8d0] sm:$0xf]  ;;  %v4105_v32 = vld [vmem:[#allocation6 + $0x8e4] sm:$0xf0]  ;;  %v3053_v36 = vor.u32 %v3919_v25, %v3052_v23  ;;  %v3605_v40 = vor.u32 %v4057_v29, %v3604_v28 }
  0x3e   : > { %1997 = vmatpush.bf16.msra.mxu0 %v2717_v4  ;;  %v3862_v33 = vld [vmem:[#allocation6 + $0x154] sm:$0xf]  ;;  %v2838_v34 = vld [vmem:[#allocation6 + $0x168] sm:$0xf0]  ;;  %v3245_v39 = vor.u32 %v3967_v27, %v3244_v26  ;;  %v3797_v41 = vor.u32 %v4105_v32, %v3796_v30  ;;  %v3580_v43 = vld [vmem:[#allocation6 + $0x720] sm:$0xf] }
  0x3f   : > { %2010 = vmatpush.bf16.msra.mxu1 %v2909_v5  ;;  %v3910_v37 = vld [vmem:[#allocation6 + $0x2d4] sm:$0xf]  ;;  %v3030_v38 = vld [vmem:[#allocation6 + $0x2e8] sm:$0xf0]  ;;  %v2841_v42 = vor.u32 %v3862_v33, %v2838_v34  ;;  %v4051_v44 = vld [vmem:[#allocation6 + $0x734] sm:$0xf0] }
  0x40   : > { %2023 = vmatpush.bf16.msra.mxu2 %v3101_v6  ;;  %v3772_v45 = vld [vmem:[#allocation6 + $0x8a0] sm:$0xf]  ;;  %v3033_v46 = vor.u32 %v3910_v37, %v3030_v38  ;;  %v4099_v47 = vld [vmem:[#allocation6 + $0x8b4] sm:$0xf0]  ;;  %v3856_v48 = vld [vmem:[#allocation6 + $0x124] sm:$0xf]  ;;  %v3581_v53 = vor.u32 %v4051_v44, %v3580_v43 }
  0x41   : > { %2036 = vmatpush.bf16.msra.mxu3 %v3293_v10  ;;  %v2814_v49 = vld [vmem:[#allocation6 + $0x138] sm:$0xf0]  ;;  %v3904_v50 = vld [vmem:[#allocation6 + $0x2a4] sm:$0xf]  ;;  %v245_v52 = vld [vmem:[%s4512_s9] sm:$0xff]  ;;  %v3773_v54 = vor.u32 %v4099_v47, %v3772_v45  ;;  %vm2461_vm0 = vcmask 1043456  }
  0x42   : > { %1998 = vmatpush.bf16.msra.mxu0 %v2693_v16  ;;  %v3006_v51 = vld [vmem:[#allocation6 + $0x2b8] sm:$0xf0]  ;;  %536 = vst [vmem:[#allocation1] ss:$4 sm:$0xff] %v245_v52  ;;  %v2817_v55 = vor.u32 %v3856_v48, %v2814_v49  ;;  %v3556_v56 = vld [vmem:[#allocation6 + $0x6f0] sm:$0xf] }
  0x43   : > { %2011 = vmatpush.bf16.msra.mxu1 %v2885_v19  ;;  %v4045_v57 = vld [vmem:[#allocation6 + $0x704] sm:$0xf0]  ;;  %v3748_v58 = vld [vmem:[#allocation6 + $0x870] sm:$0xf]  ;;  %v3009_v59 = vor.u32 %v3904_v50, %v3006_v51  ;;  %v3850_v61 = vld [vmem:[#allocation6 + $0xf4] sm:$0xf] }
  0x44   : > { %2024 = vmatpush.bf16.msra.mxu2 %v3077_v20  ;;  %v4093_v60 = vld [vmem:[#allocation6 + $0x884] sm:$0xf0]  ;;  %v2790_v62 = vld [vmem:[#allocation6 + $0x108] sm:$0xf0]  ;;  %v3898_v63 = vld [vmem:[#allocation6 + $0x274] sm:$0xf]  ;;  %v3557_v1 = vor.u32 %v4045_v57, %v3556_v56 }
  0x45   : > { %2037 = vmatpush.bf16.msra.mxu3 %v3269_v24  ;;  %v2982_v0 = vld [vmem:[#allocation6 + $0x288] sm:$0xf0]  ;;  %v3532_v2 = vld [vmem:[#allocation6 + $0x6c0] sm:$0xf]  ;;  %v4039_v3 = vld [vmem:[#allocation6 + $0x6d4] sm:$0xf0]  ;;  %v3749_v4 = vor.u32 %v4093_v60, %v3748_v58  ;;  %v2793_v5 = vor.u32 %v3850_v61, %v2790_v62 }
  0x46   : > { %1999 = vmatpush.bf16.msra.mxu0 %v2669_v31  ;;  %v3724_v6 = vld [vmem:[#allocation6 + $0x840] sm:$0xf]  ;;  %v4087_v7 = vld [vmem:[#allocation6 + $0x854] sm:$0xf0]  ;;  %v3844_v8 = vld [vmem:[#allocation6 + $0xc4] sm:$0xf]  ;;  %v2985_v9 = vor.u32 %v3898_v63, %v2982_v0  ;;  %v3533_v15 = vor.u32 %v4039_v3, %v3532_v2 }
  0x47   : > { %2012 = vmatpush.bf16.msra.mxu1 %v2861_v35  ;;  %v2766_v10 = vld [vmem:[#allocation6 + $0xd8] sm:$0xf0]  ;;  %v3892_v11 = vld [vmem:[#allocation6 + $0x244] sm:$0xf]  ;;  %v3725_v18 = vor.u32 %v4087_v7, %v3724_v6  ;;  %v3508_v20 = vld [vmem:[#allocation6 + $0x690] sm:$0xf] }
  0x48   : > { %2025 = vmatpush.bf16.msra.mxu2 %v3053_v36  ;;  %v2958_v12 = vld [vmem:[#allocation6 + $0x258] sm:$0xf0]  ;;  %v2769_v19 = vor.u32 %v3844_v8, %v2766_v10  ;;  %v4033_v21 = vld [vmem:[#allocation6 + $0x6a4] sm:$0xf0]  ;;  %v3700_v22 = vld [vmem:[#allocation6 + $0x810] sm:$0xf] }
  0x49   : > { %2038 = vmatpush.bf16.msra.mxu3 %v3245_v39  ;;  %v4523_v13 = vld.sshfl [vmem:[#allocation1] sm:$0xff pattern:$0x73625140]  ;;  %v4525_v14 = vld.sshfl [vmem:[#allocation1 + $0x8] sm:$0xff pattern:$0x73625140]  ;;  %v2961_v23 = vor.u32 %v3892_v11, %v2958_v12  ;;  %v3509_v29 = vor.u32 %v4033_v21, %v3508_v20 }
  0x4a   : > { %2044 = vmatpush.bf16.msrb.mxu0 %v3605_v40  ;;  %2013 = vmatmul.bf16.vlgmr.msra.gmra.mxu1 %v4525_v14  ;;  %v4528_v16 = vld.sshfl [vmem:[#allocation1 + $0x10] sm:$0xff pattern:$0x73625140]  ;;  %v4530_v17 = vld.sshfl [vmem:[#allocation1 + $0x18] sm:$0xff pattern:$0x73625140] }
  0x4b   : > { %2057 = vmatpush.bf16.msrb.mxu1 %v3797_v41  ;;  %2000 = vmatmul.bf16.vlgmr.msra.gmra.mxu0 %v4523_v13  ;;  %v4081_v24 = vld [vmem:[#allocation6 + $0x824] sm:$0xf0]  ;;  %v3838_v25 = vld [vmem:[#allocation6 + $0x94] sm:$0xf]  ;;  %v2742_v26 = vld [vmem:[#allocation6 + $0xa8] sm:$0xf0] }
  0x4c   : > { %2070 = vmatpush.bf16.msrb.mxu2 %v2841_v42  ;;  %v3886_v27 = vld [vmem:[#allocation6 + $0x214] sm:$0xf]  ;;  %v2934_v28 = vld [vmem:[#allocation6 + $0x228] sm:$0xf0]  ;;  %2039 = vmatmul.bf16.vlgmr.msra.gmra.mxu3 %v4530_v17  ;;  %v3701_v30 = vor.u32 %v4081_v24, %v3700_v22  ;;  %v2745_v31 = vor.u32 %v3838_v25, %v2742_v26  ;;  %v3484_v32 = vld [vmem:[#allocation6 + $0x660] sm:$0xf] }
  0x4d   : > { %2083 = vmatpush.bf16.msrb.mxu3 %v3033_v46  ;;  %2026 = vmatmul.bf16.vlgmr.msra.gmra.mxu2 %v4528_v16  ;;  %v4027_v33 = vld [vmem:[#allocation6 + $0x674] sm:$0xf0]  ;;  %v3676_v34 = vld [vmem:[#allocation6 + $0x7e0] sm:$0xf]  ;;  %v2937_v35 = vor.u32 %v3886_v27, %v2934_v28  ;;  %v3832_v37 = vld [vmem:[#allocation6 + $0x64] sm:$0xf] }
  0x4e   : > { %2045 = vmatpush.bf16.msrb.mxu0 %v3581_v53  ;;  %v4075_v36 = vld [vmem:[#allocation6 + $0x7f4] sm:$0xf0]  ;;  %v2718_v38 = vld [vmem:[#allocation6 + $0x78] sm:$0xf0]  ;;  %v3880_v39 = vld [vmem:[#allocation6 + $0x1e4] sm:$0xf]  ;;  %v3485_v42 = vor.u32 %v4027_v33, %v3484_v32 }
  0x4f   : > { %2058 = vmatpush.bf16.msrb.mxu1 %v3773_v54  ;;  %v2910_v40 = vld [vmem:[#allocation6 + $0x1f8] sm:$0xf0]  ;;  %v3677_v43 = vor.u32 %v4075_v36, %v3676_v34  ;;  %v2721_v44 = vor.u32 %v3832_v37, %v2718_v38  ;;  %v3460_v45 = vld [vmem:[#allocation6 + $0x630] sm:$0xf]  ;;  %v4021_v46 = vld [vmem:[#allocation6 + $0x644] sm:$0xf0] }
  0x50   : > { %2071 = vmatpush.bf16.msrb.mxu2 %v2817_v55  ;;  %v246_v41 = vld [vmem:[%s4512_s9 + $0x8] sm:$0xf]  ;;  %v2913_v48 = vor.u32 %v3880_v39, %v2910_v40  ;;  %v4069_v49 = vld [vmem:[#allocation6 + $0x7c4] sm:$0xf0]  ;;  %v3826_v50 = vld [vmem:[#allocation6 + $0x34] sm:$0xf]  ;;  %v3461_v54 = vor.u32 %v4021_v46, %v3460_v45 }
  0x51   : > { %2084 = vmatpush.bf16.msrb.mxu3 %v3009_v59  ;;  %539 = vst [vmem:[#allocation1 + $0x20] ss:$4 sm:$0xff] %v246_v41  ;;  %v3652_v47 = vld [vmem:[#allocation6 + $0x7b0] sm:$0xf]  ;;  %v2694_v51 = vld [vmem:[#allocation6 + $0x48] sm:$0xf0] }
  0x52   : > { %2046 = vmatpush.bf16.msrb.mxu0 %v3557_v1  ;;  %v3874_v52 = vld [vmem:[#allocation6 + $0x1b4] sm:$0xf]  ;;  %v2886_v53 = vld [vmem:[#allocation6 + $0x1c8] sm:$0xf0]  ;;  %v3436_v55 = vld [vmem:[#allocation6 + $0x600] sm:$0xf]  ;;  %v3653_v57 = vor.u32 %v4069_v49, %v3652_v47  ;;  %v2697_v58 = vor.u32 %v3826_v50, %v2694_v51 }
  0x53   : > { %2059 = vmatpush.bf16.msrb.mxu1 %v3749_v4  ;;  %v4015_v56 = vld [vmem:[#allocation6 + $0x614] sm:$0xf0]  ;;  %v3628_v59 = vld [vmem:[#allocation6 + $0x780] sm:$0xf]  ;;  %v3820_v61 = vld [vmem:[#allocation6 + $0x4] sm:$0xf]  ;;  %v2889_v62 = vor.u32 %v3874_v52, %v2886_v53 }
  0x54   : > { %2072 = vmatpush.bf16.msrb.mxu2 %v2793_v5  ;;  %v4063_v60 = vld [vmem:[#allocation6 + $0x794] sm:$0xf0]  ;;  %v2670_v63 = vld [vmem:[#allocation6 + $0x18] sm:$0xf0]  ;;  %v3868_v0 = vld [vmem:[#allocation6 + $0x184] sm:$0xf]  ;;  %v3437_v5 = vor.u32 %v4015_v56, %v3436_v55 }
  0x55   : > { %2085 = vmatpush.bf16.msrb.mxu3 %v2985_v9  ;;  %v2862_v1 = vld [vmem:[#allocation6 + $0x198] sm:$0xf0]  ;;  %v3958_v2 = vld [vmem:[#allocation6 + $0x454] sm:$0xf]  ;;  %v3222_v3 = vld [vmem:[#allocation6 + $0x468] sm:$0xf0]  ;;  %v3629_v9 = vor.u32 %v4063_v60, %v3628_v59  ;;  %v2673_v10 = vor.u32 %v3820_v61, %v2670_v63 }
  0x56   : > { %2047 = vmatpush.bf16.msrb.mxu0 %v3533_v15  ;;  %v4006_v4 = vld [vmem:[#allocation6 + $0x5d4] sm:$0xf]  ;;  %v3414_v6 = vld [vmem:[#allocation6 + $0x5e8] sm:$0xf0]  ;;  %v2865_v15 = vor.u32 %v3868_v0, %v2862_v1  ;;  %v3198_v22 = vld [vmem:[#allocation6 + $0x438] sm:$0xf0] }
  0x57   : > { %2060 = vmatpush.bf16.msrb.mxu1 %v3725_v18  ;;  %v4054_v7 = vld [vmem:[#allocation6 + $0x754] sm:$0xf]  ;;  %v3606_v8 = vld [vmem:[#allocation6 + $0x768] sm:$0xf0]  ;;  %v3225_v18 = vor.u32 %v3958_v2, %v3222_v3  ;;  %v3417_v20 = vor.u32 %v4006_v4, %v3414_v6  ;;  %v3390_v24 = vld [vmem:[#allocation6 + $0x5b8] sm:$0xf0] }
  0x58   : > { %2073 = vmatpush.bf16.msrb.mxu2 %v2769_v19  ;;  %v4102_v11 = vld [vmem:[#allocation6 + $0x8d4] sm:$0xf]  ;;  %v3798_v12 = vld [vmem:[#allocation6 + $0x8e8] sm:$0xf0]  ;;  %v3952_v19 = vld [vmem:[#allocation6 + $0x424] sm:$0xf]  ;;  %v3609_v21 = vor.u32 %v4054_v7, %v3606_v8 }
  0x59   : > { %2086 = vmatpush.bf16.msrb.mxu3 %v2961_v23  ;;  %v4000_v23 = vld [vmem:[#allocation6 + $0x5a4] sm:$0xf]  ;;  %v3801_v25 = vor.u32 %v4102_v11, %v3798_v12  ;;  %v3582_v27 = vld [vmem:[#allocation6 + $0x738] sm:$0xf0]  ;;  %v3201_v32 = vor.u32 %v3952_v19, %v3198_v22  ;;  %v3174_v36 = vld [vmem:[#allocation6 + $0x408] sm:$0xf0] }
  0x5a   : > { %2048 = vmatpush.bf16.msrb.mxu0 %v3509_v29  ;;  %v4048_v26 = vld [vmem:[#allocation6 + $0x724] sm:$0xf]  ;;  %v4536_v29 = vld.sshfl [vmem:[#allocation1 + $0x20] sm:$0xff pattern:$0x73625140]  ;;  %v3393_v33 = vor.u32 %v4000_v23, %v3390_v24  ;;  %vm2515_vm1 = vcmask 1040384  }
  0x5b   : > { %2061 = vmatpush.bf16.msrb.mxu1 %v3701_v30  ;;  %v4096_v28 = vld [vmem:[#allocation6 + $0x8a4] sm:$0xf]  ;;  %v3774_v30 = vld [vmem:[#allocation6 + $0x8b8] sm:$0xf0]  ;;  %v3585_v34 = vor.u32 %v4048_v26, %v3582_v27  ;;  %v3994_v37 = vld [vmem:[#allocation6 + $0x574] sm:$0xf] }
  0x5c   : > { %2074 = vmatpush.bf16.msrb.mxu2 %v2745_v31  ;;  %v4538_v31 = vld.sshfl [vmem:[#allocation1 + $0x28] sm:$0xff pattern:$0x73625140]  ;;  %v3777_v38 = vor.u32 %v4096_v28, %v3774_v30  ;;  %v3366_v39 = vld [vmem:[#allocation6 + $0x588] sm:$0xf0]  ;;  %vm2517_vm2 = vcmask 1041408  }
  0x5d   : > { %2087 = vmatpush.bf16.msrb.mxu3 %v2937_v35  ;;  %v3946_v35 = vld [vmem:[#allocation6 + $0x3f4] sm:$0xf]  ;;  %v3558_v41 = vld [vmem:[#allocation6 + $0x708] sm:$0xf0]  ;;  %v3369_v45 = vor.u32 %v3994_v37, %v3366_v39  ;;  %v3940_v47 = vld [vmem:[#allocation6 + $0x3c4] sm:$0xf] }
  0x5e   : > { %2049 = vmatpush.bf16.msrb.mxu0 %v3485_v42  ;;  %v4042_v40 = vld [vmem:[#allocation6 + $0x6f4] sm:$0xf]  ;;  %v3988_v49 = vld [vmem:[#allocation6 + $0x544] sm:$0xf]  ;;  %v3342_v51 = vld [vmem:[#allocation6 + $0x558] sm:$0xf0] }
  0x5f   : > { %2062 = vmatpush.bf16.msrb.mxu1 %v3677_v43  ;;  %v4090_v42 = vld [vmem:[#allocation6 + $0x874] sm:$0xf]  ;;  %v3750_v43 = vld [vmem:[#allocation6 + $0x888] sm:$0xf0]  ;;  %v3561_v46 = vor.u32 %v4042_v40, %v3558_v41  ;;  %v4036_v52 = vld [vmem:[#allocation6 + $0x6c4] sm:$0xf] }
  0x60   : > { %2075 = vmatpush.bf16.msrb.mxu2 %v2721_v44  ;;  %v3177_v44 = vor.u32 %v3946_v35, %v3174_v36  ;;  %v3753_v50 = vor.u32 %v4090_v42, %v3750_v43  ;;  %v3534_v53 = vld [vmem:[#allocation6 + $0x6d8] sm:$0xf0]  ;;  %v3934_v59 = vld [vmem:[#allocation6 + $0x394] sm:$0xf]  ;;  %v3126_v60 = vld [vmem:[#allocation6 + $0x3a8] sm:$0xf0] }
  0x61   : > { %2088 = vmatpush.bf16.msrb.mxu3 %v2913_v48  ;;  %v3150_v48 = vld [vmem:[#allocation6 + $0x3d8] sm:$0xf0]  ;;  %v3982_v61 = vld [vmem:[#allocation6 + $0x514] sm:$0xf]  ;;  %v3318_v63 = vld [vmem:[#allocation6 + $0x528] sm:$0xf0]  ;;  %v3129_v4 = vor.u32 %v3934_v59, %v3126_v60 }
  0x62   : > { %2050 = vmatpush.bf16.msrb.mxu0 %v3461_v54  ;;  %v4084_v54 = vld [vmem:[#allocation6 + $0x844] sm:$0xf]  ;;  %v3726_v55 = vld [vmem:[#allocation6 + $0x858] sm:$0xf0]  ;;  %v3153_v56 = vor.u32 %v3940_v47, %v3150_v48  ;;  %v4030_v0 = vld [vmem:[#allocation6 + $0x694] sm:$0xf] }
  0x63   : > { %2063 = vmatpush.bf16.msrb.mxu1 %v3653_v57  ;;  %v3345_v57 = vor.u32 %v3988_v49, %v3342_v51  ;;  %v3510_v1 = vld [vmem:[#allocation6 + $0x6a8] sm:$0xf0]  ;;  %v4078_v2 = vld [vmem:[#allocation6 + $0x814] sm:$0xf]  ;;  %v3928_v7 = vld [vmem:[#allocation6 + $0x364] sm:$0xf] }
  0x64   : > { %2076 = vmatpush.bf16.msrb.mxu2 %v2697_v58  ;;  %v3537_v58 = vor.u32 %v4036_v52, %v3534_v53  ;;  %v3702_v3 = vld [vmem:[#allocation6 + $0x828] sm:$0xf0]  ;;  %v3513_v6 = vor.u32 %v4030_v0, %v3510_v1  ;;  %v3102_v8 = vld [vmem:[#allocation6 + $0x378] sm:$0xf0]  ;;  %v4024_v12 = vld [vmem:[#allocation6 + $0x664] sm:$0xf] }
  0x65   : > { %2089 = vmatpush.bf16.msrb.mxu3 %v2889_v62  ;;  %v3729_v62 = vor.u32 %v4084_v54, %v3726_v55  ;;  %v3294_v11 = vld [vmem:[#allocation6 + $0x4f8] sm:$0xf0]  ;;  %v3922_v23 = vld [vmem:[#allocation6 + $0x334] sm:$0xf]  ;;  %v3078_v24 = vld [vmem:[#allocation6 + $0x348] sm:$0xf0] }
  0x66   : > { %2051 = vmatpush.bf16.msrb.mxu0 %v3437_v5  ;;  %v3321_v5 = vor.u32 %v3982_v61, %v3318_v63  ;;  %v3678_v19 = vld [vmem:[#allocation6 + $0x7f8] sm:$0xf0]  ;;  %v3270_v27 = vld [vmem:[#allocation6 + $0x4c8] sm:$0xf0]  ;;  %v4018_v28 = vld [vmem:[#allocation6 + $0x634] sm:$0xf] }
  0x67   : > { %2064 = vmatpush.bf16.msrb.mxu1 %v3629_v9  ;;  %v3976_v9 = vld [vmem:[#allocation6 + $0x4e4] sm:$0xf]  ;;  %v3462_v30 = vld [vmem:[#allocation6 + $0x648] sm:$0xf0]  ;;  %v3054_v36 = vld [vmem:[#allocation6 + $0x318] sm:$0xf0] }
  0x68   : > { %2077 = vmatpush.bf16.msrb.mxu2 %v2673_v10  ;;  %v3705_v10 = vor.u32 %v4078_v2, %v3702_v3  ;;  %v3916_v35 = vld [vmem:[#allocation6 + $0x304] sm:$0xf]  ;;  %v3246_v40 = vld [vmem:[#allocation6 + $0x498] sm:$0xf0]  ;;  %v3866_v47 = vld [vmem:[#allocation6 + $0x16c] sm:$0xf0] }
  0x69   : > { %2090 = vmatpush.bf16.msrb.mxu3 %v2865_v15  ;;  %2052 = vmatmul.bf16.vlgmr.msrb.gmra.mxu0 %v4536_v29  ;;  %v3486_v15 = vld [vmem:[#allocation6 + $0x678] sm:$0xf0]  ;;  %v3964_v39 = vld [vmem:[#allocation6 + $0x484] sm:$0xf]  ;;  %v3036_v48 = vld [vmem:[#allocation6 + $0x2d8] sm:$0xf]  ;;  %v3057_v49 = vor.u32 %v3916_v35, %v3054_v36 }
  0x6a   : > { %2096 = vmatpush.bf16.msra.mxu0 %v3225_v18  ;;  %2065 = vmatmul.bf16.vlgmr.msrb.gmra.mxu1 %v4538_v31  ;;  %v4072_v18 = vld [vmem:[#allocation6 + $0x7e4] sm:$0xf]  ;;  %v3489_v22 = vor.u32 %v4024_v12, %v3486_v15  ;;  %v3438_v43 = vld [vmem:[#allocation6 + $0x618] sm:$0xf0]  ;;  %v3228_v51 = vld [vmem:[#allocation6 + $0x458] sm:$0xf]  ;;  %v3249_v53 = vor.u32 %v3964_v39, %v3246_v40 }
  0x6b   : > { %2109 = vmatpush.bf16.msra.mxu1 %v3417_v20  ;;  %2078 = vmatmul.bf16.vlgmr.msrb.gmra.mxu2 %v4523_v13  ;;  %v3105_v20 = vor.u32 %v3928_v7, %v3102_v8  ;;  %v3681_v26 = vor.u32 %v4072_v18, %v3678_v19  ;;  %v4012_v41 = vld [vmem:[#allocation6 + $0x604] sm:$0xf]  ;;  %v3962_v52 = vld [vmem:[#allocation6 + $0x46c] sm:$0xf0]  ;;  %v3420_v55 = vld [vmem:[#allocation6 + $0x5d8] sm:$0xf] }
  0x6c   : > { %2122 = vmatpush.bf16.msra.mxu2 %v3609_v21  ;;  %2091 = vmatmul.bf16.vlgmr.msrb.gmra.mxu3 %v4525_v14  ;;  %v3297_v21 = vor.u32 %v3976_v9, %v3294_v11  ;;  %v3441_v54 = vor.u32 %v4012_v41, %v3438_v43  ;;  %v3229_v60 = vor.u32 %v3962_v52, %v3228_v51  ;;  %v2820_v61 = vld [vmem:[#allocation6 + $0x128] sm:$0xf]  ;;  %v3908_v1 = vld [vmem:[#allocation6 + $0x2bc] sm:$0xf0]  ;;  %v2796_v9 = vld [vmem:[#allocation6 + $0xf8] sm:$0xf] }
  0x6d   : > { %2135 = vmatpush.bf16.msra.mxu3 %v3801_v25  ;;  %v3970_v25 = vld [vmem:[#allocation6 + $0x4b4] sm:$0xf]  ;;  %v3012_v63 = vld [vmem:[#allocation6 + $0x2a8] sm:$0xf]  ;;  %v3956_v3 = vld [vmem:[#allocation6 + $0x43c] sm:$0xf0] }
  0x6e   : > { %2097 = vmatpush.bf16.msra.mxu0 %v3201_v32  ;;  %v4066_v32 = vld [vmem:[#allocation6 + $0x7b4] sm:$0xf]  ;;  %v3273_v37 = vor.u32 %v3970_v25, %v3270_v27  ;;  %v3204_v2 = vld [vmem:[#allocation6 + $0x428] sm:$0xf]  ;;  %v3013_v7 = vor.u32 %v3908_v1, %v3012_v63  ;;  %v2988_v11 = vld [vmem:[#allocation6 + $0x278] sm:$0xf] }
  0x6f   : > { %2110 = vmatpush.bf16.msra.mxu1 %v3393_v33  ;;  %v3654_v33 = vld [vmem:[#allocation6 + $0x7c8] sm:$0xf0]  ;;  %v3205_v8 = vor.u32 %v3956_v3, %v3204_v2  ;;  %v3902_v15 = vld [vmem:[#allocation6 + $0x28c] sm:$0xf0]  ;;  %v3180_v18 = vld [vmem:[#allocation6 + $0x3f8] sm:$0xf] }
  0x70   : > { %2123 = vmatpush.bf16.msra.mxu2 %v3585_v34  ;;  %v3081_v34 = vor.u32 %v3922_v23, %v3078_v24  ;;  %v3657_v42 = vor.u32 %v4066_v32, %v3654_v33  ;;  %v3950_v19 = vld [vmem:[#allocation6 + $0x40c] sm:$0xf0]  ;;  %v2989_v23 = vor.u32 %v3902_v15, %v2988_v11  ;;  %v2772_v25 = vld [vmem:[#allocation6 + $0xc8] sm:$0xf]  ;;  %v3944_v33 = vld [vmem:[#allocation6 + $0x3dc] sm:$0xf0] }
  0x71   : > { %2136 = vmatpush.bf16.msra.mxu3 %v3777_v38  ;;  %v3465_v38 = vor.u32 %v4018_v28, %v3462_v30  ;;  %v3181_v24 = vor.u32 %v3950_v19, %v3180_v18  ;;  %v2964_v27 = vld [vmem:[#allocation6 + $0x248] sm:$0xf]  ;;  %v3896_v30 = vld [vmem:[#allocation6 + $0x25c] sm:$0xf0]  ;;  %v2748_v39 = vld [vmem:[#allocation6 + $0x98] sm:$0xf] }
  0x72   : > { %2098 = vmatpush.bf16.msra.mxu0 %v3177_v44  ;;  %v4060_v44 = vld [vmem:[#allocation6 + $0x784] sm:$0xf]  ;;  %v3156_v32 = vld [vmem:[#allocation6 + $0x3c8] sm:$0xf]  ;;  %v3992_v35 = vld [vmem:[#allocation6 + $0x55c] sm:$0xf0] }
  0x73   : > { %2111 = vmatpush.bf16.msra.mxu1 %v3369_v45  ;;  %v3630_v45 = vld [vmem:[#allocation6 + $0x798] sm:$0xf0]  ;;  %v3842_v40 = vld [vmem:[#allocation6 + $0xac] sm:$0xf0]  ;;  %v2940_v41 = vld [vmem:[#allocation6 + $0x218] sm:$0xf] }
  0x74   : > { %2124 = vmatpush.bf16.msra.mxu2 %v3561_v46  ;;  %v2844_v46 = vld [vmem:[#allocation6 + $0x158] sm:$0xf]  ;;  %v3890_v43 = vld [vmem:[#allocation6 + $0x22c] sm:$0xf0]  ;;  %v2724_v51 = vld [vmem:[#allocation6 + $0x68] sm:$0xf] }
  0x75   : > { %2137 = vmatpush.bf16.msra.mxu3 %v3753_v50  ;;  %v3914_v50 = vld [vmem:[#allocation6 + $0x2ec] sm:$0xf0]  ;;  %v3836_v52 = vld [vmem:[#allocation6 + $0x7c] sm:$0xf0]  ;;  %v2700_v63 = vld [vmem:[#allocation6 + $0x38] sm:$0xf] }
  0x76   : > { %2099 = vmatpush.bf16.msra.mxu0 %v3153_v56  ;;  %v4010_v56 = vld [vmem:[#allocation6 + $0x5ec] sm:$0xf0]  ;;  %v3037_v59 = vor.u32 %v3914_v50, %v3036_v48  ;;  %v2749_v48 = vor.u32 %v3842_v40, %v2748_v39  ;;  %v2892_v1 = vld [vmem:[#allocation6 + $0x1b8] sm:$0xf]  ;;  %v2868_v15 = vld [vmem:[#allocation6 + $0x188] sm:$0xf] }
  0x77   : > { %2112 = vmatpush.bf16.msra.mxu1 %v3345_v57  ;;  %v3633_v57 = vor.u32 %v4060_v44, %v3630_v45  ;;  %v3421_v0 = vor.u32 %v4010_v56, %v3420_v55  ;;  %v3132_v44 = vld [vmem:[#allocation6 + $0x398] sm:$0xf]  ;;  %v3938_v45 = vld [vmem:[#allocation6 + $0x3ac] sm:$0xf0]  ;;  %v3884_v55 = vld [vmem:[#allocation6 + $0x1fc] sm:$0xf0] }
  0x78   : > { %2125 = vmatpush.bf16.msra.mxu2 %v3537_v58  ;;  %v2845_v58 = vor.u32 %v3866_v47, %v2844_v46  ;;  %v3324_v46 = vld [vmem:[#allocation6 + $0x518] sm:$0xf]  ;;  %v3986_v47 = vld [vmem:[#allocation6 + $0x52c] sm:$0xf0]  ;;  %v3133_v50 = vor.u32 %v3938_v45, %v3132_v44  ;;  %v3108_v56 = vld [vmem:[#allocation6 + $0x368] sm:$0xf] }
  0x79   : > { %2138 = vmatpush.bf16.msra.mxu3 %v3729_v62  ;;  %v3860_v62 = vld [vmem:[#allocation6 + $0x13c] sm:$0xf0]  ;;  %v3878_v3 = vld [vmem:[#allocation6 + $0x1cc] sm:$0xf0]  ;;  %v3060_v19 = vld [vmem:[#allocation6 + $0x308] sm:$0xf] }
  0x7a   : > { %2100 = vmatpush.bf16.msra.mxu0 %v3129_v4  ;;  %v3396_v4 = vld [vmem:[#allocation6 + $0x5a8] sm:$0xf]  ;;  %v2893_v11 = vor.u32 %v3878_v3, %v2892_v1  ;;  %v3872_v18 = vld [vmem:[#allocation6 + $0x19c] sm:$0xf0]  ;;  %vm2519_vm4 = vcmask 1043459   ;;  %vm2521_vm5 = vcmask 1044483  }
  0x7b   : > { %2113 = vmatpush.bf16.msra.mxu1 %v3321_v5  ;;  %v4004_v5 = vld [vmem:[#allocation6 + $0x5bc] sm:$0xf0]  ;;  %v3540_v1 = vld [vmem:[#allocation6 + $0x6c8] sm:$0xf]  ;;  %vm2523_vm6 = vcmask 1042432   ;;  %s4111_s19 = smul.u32 6, %s4508_s6 }
  0x7c   : > { %2126 = vmatpush.bf16.msra.mxu2 %v3513_v6  ;;  %v2821_v6 = vor.u32 %v3860_v62, %v2820_v61  ;;  %v3397_v12 = vor.u32 %v4004_v5, %v3396_v4  ;;  %v3084_v4 = vld [vmem:[#allocation6 + $0x338] sm:$0xf]  ;;  %v3926_v5 = vld [vmem:[#allocation6 + $0x34c] sm:$0xf0]  ;;  %v4100_v45 = vld [vmem:[#allocation6 + $0x8bc] sm:$0xf0] }
  0x7d   : > { %2139 = vmatpush.bf16.msra.mxu3 %v3705_v10  ;;  %v3854_v10 = vld [vmem:[#allocation6 + $0x10c] sm:$0xf0]  ;;  %v3732_v3 = vld [vmem:[#allocation6 + $0x848] sm:$0xf]  ;;  %s4112_s23 = smul.u32 6, %s4373_s15  ;;  %s235_s25 = scalar_lea.vmem [#allocation9], %s4111_s19 }
  0x7e   : > { %2101 = vmatpush.bf16.msra.mxu0 %v3105_v20  ;;  %v3372_v20 = vld [vmem:[#allocation6 + $0x578] sm:$0xf]  ;;  %s2553_s26 = sshll.u32 %s235_s25, 4  ;;  %s2541_s28 = scalar_lea.sflag [#allocation5], %s4508_s6  ;;  %s2554_s26 = int_to_ptr.vmem [resolvable:$true] %s2553_s26 }
  0x7f   : > { %2114 = vmatpush.bf16.msra.mxu1 %v3297_v21  ;;  %v3998_v21 = vld [vmem:[#allocation6 + $0x58c] sm:$0xf0]  ;;  %s2551_s18 = scalar_lea.hbm %s4658_s3, %s4112_s23  ;;  %s4315_s5 = scalar_lea.hbm %s4658_s3, 12 }
  0x80   : > { %2127 = vmatpush.bf16.msra.mxu2 %v3489_v22  ;;  %v2797_v22 = vor.u32 %v3854_v10, %v2796_v9  ;;  %v3373_v28 = vor.u32 %v3998_v21, %v3372_v20  ;;  %v2676_v9 = vld [vmem:[#allocation6 + $0x8] sm:$0xf]  ;;  %v3824_v10 = vld [vmem:[#allocation6 + $0x1c] sm:$0xf0]  ;;  %s2555_s27 = sshll.u32 %s2551_s18, 4  ;;  %s2556_s27 = int_to_ptr.hbm [resolvable:$true] %s2555_s27 }
  0x81   : > { %2140 = vmatpush.bf16.msra.mxu3 %v3681_v26  ;;  %v3848_v26 = vld [vmem:[#allocation6 + $0xdc] sm:$0xf0]  ;;  %s4309_s29 = sshra.s32 %s2556_s27, 4  ;;  %s4310_s29 = int_to_ptr.hbm [resolvable:$true] %s4309_s29 }
  0x82   : > { %2102 = vmatpush.bf16.msra.mxu0 %v3081_v34  ;;  %v3348_v34 = vld [vmem:[#allocation6 + $0x548] sm:$0xf]  ;;  %v2773_v36 = vor.u32 %v3848_v26, %v2772_v25  ;;  %v3920_v21 = vld [vmem:[#allocation6 + $0x31c] sm:$0xf0]  ;;  %v4058_v25 = vld [vmem:[#allocation6 + $0x76c] sm:$0xf0]  ;;  %p4316_p10 = scmp.lt.s32.totalorder %s4310_s29, %s4658_s3 }
  0x83   : > { %2115 = vmatpush.bf16.msra.mxu1 %v3273_v37  ;;  %v2965_v37 = vor.u32 %v3896_v30, %v2964_v27  ;;  %v3804_v26 = vld [vmem:[#allocation6 + $0x8d8] sm:$0xf]  ;;  %v2677_v27 = vor.u32 %v3824_v10, %v2676_v9  ;;  %v3863_v30 = vld [vmem:[#allocation6 + $0x15c] sm:$0xf]  ;;  %v4034_v10 = vld [vmem:[#allocation6 + $0x6ac] sm:$0xf0] }
  0x84   : > { %2128 = vmatpush.bf16.msra.mxu2 %v3465_v38  ;;  %v3157_v38 = vor.u32 %v3944_v33, %v3156_v32  ;;  %v2846_v32 = vld [vmem:[#allocation6 + $0x170] sm:$0xf0]  ;;  %v2869_v33 = vor.u32 %v3872_v18, %v2868_v15  ;;  %v3516_v9 = vld [vmem:[#allocation6 + $0x698] sm:$0xf]  ;;  %v4082_v15 = vld [vmem:[#allocation6 + $0x82c] sm:$0xf0] }
  0x85   : > { %2141 = vmatpush.bf16.msra.mxu3 %v3657_v42  ;;  %v3349_v42 = vor.u32 %v3992_v35, %v3348_v34  ;;  %v3061_v34 = vor.u32 %v3920_v21, %v3060_v19  ;;  %v3911_v35 = vld [vmem:[#allocation6 + $0x2dc] sm:$0xf]  ;;  %v2849_v40 = vor.u32 %v3863_v30, %v2846_v32  ;;  %v2750_v19 = vld [vmem:[#allocation6 + $0xb0] sm:$0xf0]  ;;  %v4076_v30 = vld [vmem:[#allocation6 + $0x7fc] sm:$0xf0] }
  0x86   : > { %2103 = vmatpush.bf16.msra.mxu0 %v3057_v49  ;;  %v2941_v49 = vor.u32 %v3890_v43, %v2940_v41  ;;  %v3588_v41 = vld [vmem:[#allocation6 + $0x728] sm:$0xf]  ;;  %v3839_v18 = vld [vmem:[#allocation6 + $0x9c] sm:$0xf]  ;;  %v2942_v21 = vld [vmem:[#allocation6 + $0x230] sm:$0xf0] }
  0x87   : > { %2116 = vmatpush.bf16.msra.mxu1 %v3249_v53  ;;  %v2916_v53 = vld [vmem:[#allocation6 + $0x1e8] sm:$0xf]  ;;  %v3833_v32 = vld [vmem:[#allocation6 + $0x6c] sm:$0xf]  ;;  %s4311_s15 = scalar_lea.hbm %s4310_s29, 6 }
  0x88   : > { %2129 = vmatpush.bf16.msra.mxu2 %v3441_v54  ;;  %v3325_v54 = vor.u32 %v3986_v47, %v3324_v46  ;;  %v2917_v61 = vor.u32 %v3884_v55, %v2916_v53  ;;  %v3780_v43 = vld [vmem:[#allocation6 + $0x8a8] sm:$0xf]  ;;  %v3857_v46 = vld [vmem:[#allocation6 + $0x12c] sm:$0xf]  ;;  %v2822_v47 = vld [vmem:[#allocation6 + $0x140] sm:$0xf0]  ;;  %p4312_p1 = scmp.ne.s32.totalorder %s4310_s29, %s4311_s15  ;;  %p4317_p11 = scmp.lt.s32.totalorder %s4315_s5, %s4311_s15 }
  0x89   : > { %2142 = vmatpush.bf16.msra.mxu3 %v3633_v57  ;;  %2104 = vmatmul.bf16.vlgmr.msra.gmra.mxu0 %v4528_v16  ;;  %v3932_v57 = vld [vmem:[#allocation6 + $0x37c] sm:$0xf0]  ;;  %v3564_v53 = vld [vmem:[#allocation6 + $0x6f8] sm:$0xf] }
  0x8a   : > { %2148 = vmatpush.bf16.msrb.mxu0 %v2845_v58  ;;  %2117 = vmatmul.bf16.vlgmr.msra.gmra.mxu1 %v4530_v17  ;;  %v3300_v58 = vld [vmem:[#allocation6 + $0x4e8] sm:$0xf]  ;;  %v3109_v62 = vor.u32 %v3932_v57, %v3108_v56  ;;  %v3756_v55 = vld [vmem:[#allocation6 + $0x878] sm:$0xf]  ;;  %v4094_v57 = vld [vmem:[#allocation6 + $0x88c] sm:$0xf0]  ;;  %p4313_p3 = pnand %p4312_p1, %p4486_p2  ;;  %p4318_p12 = por %p4317_p11, %p4316_p10 }
  0x8b   : > { %2161 = vmatpush.bf16.msrb.mxu1 %v3037_v59  ;;  %2130 = vmatmul.bf16.vlgmr.msra.gmra.mxu2 %v4536_v29  ;;  %v3980_v59 = vld [vmem:[#allocation6 + $0x4fc] sm:$0xf0] }
  0x8c   : > { %2174 = vmatpush.bf16.msrb.mxu2 %v3229_v60  ;;  %2143 = vmatmul.bf16.vlgmr.msra.gmra.mxu3 %v4538_v31  ;;  %v2725_v60 = vor.u32 %v3836_v52, %v2724_v51  ;;  %v3301_v2 = vor.u32 %v3980_v59, %v3300_v58  ;;  %v3781_v51 = vor.u32 %v4100_v45, %v3780_v43  ;;  %v3851_v58 = vld [vmem:[#allocation6 + $0xfc] sm:$0xf]  ;;  %v2798_v59 = vld [vmem:[#allocation6 + $0x110] sm:$0xf0]  ;;  %v4070_v43 = vld [vmem:[#allocation6 + $0x7cc] sm:$0xf0]  ;;  %p4314_p9 = pneg %p4313_p3 }
  0x8d   : > { %2187 = vmatpush.bf16.msrb.mxu3 %v3421_v0  ;;  %v3830_v0 = vld [vmem:[#allocation6 + $0x4c] sm:$0xf0]  ;;  %v2825_v52 = vor.u32 %v3857_v46, %v2822_v47  ;;  %v2702_v45 = vld [vmem:[#allocation6 + $0x50] sm:$0xf0]  ;;  %v3875_v46 = vld [vmem:[#allocation6 + $0x1bc] sm:$0xf] }
  0x8e   : > { %2149 = vmatpush.bf16.msrb.mxu0 %v2821_v6  ;;  %v3276_v6 = vld [vmem:[#allocation6 + $0x4b8] sm:$0xf]  ;;  %v2894_v47 = vld [vmem:[#allocation6 + $0x1d0] sm:$0xf0]  ;;  %p4319_p13 = pnand %p4318_p12, %p4314_p9 }
  0x8f   : > { %2162 = vmatpush.bf16.msrb.mxu1 %v3013_v7  ;;  %v3974_v7 = vld [vmem:[#allocation6 + $0x4cc] sm:$0xf0] }
  0x90   : > { %2175 = vmatpush.bf16.msrb.mxu2 %v3205_v8  ;;  %v2701_v8 = vor.u32 %v3830_v0, %v2700_v63  ;;  %v3277_v20 = vor.u32 %v3974_v7, %v3276_v6  ;;  %v3757_v63 = vor.u32 %v4094_v57, %v3756_v55  ;;  %v2801_v0 = vor.u32 %v3851_v58, %v2798_v59  ;;  %v2774_v6 = vld [vmem:[#allocation6 + $0xe0] sm:$0xf0]  ;;  %v3893_v7 = vld [vmem:[#allocation6 + $0x24c] sm:$0xf] }
  0x91   : > { %2188 = vmatpush.bf16.msrb.mxu3 %v3397_v12  ;;  %v3085_v12 = vor.u32 %v3926_v5, %v3084_v4  ;;  %v3845_v5 = vld [vmem:[#allocation6 + $0xcc] sm:$0xf]  ;;  %v2678_v57 = vld [vmem:[#allocation6 + $0x20] sm:$0xf0] }
  0x92   : > { %2150 = vmatpush.bf16.msrb.mxu0 %v2797_v22  ;;  %v3252_v22 = vld [vmem:[#allocation6 + $0x488] sm:$0xf]  ;;  %v3821_v55 = vld [vmem:[#allocation6 + $0xc] sm:$0xf]  ;;  %v2870_v59 = vld [vmem:[#allocation6 + $0x1a0] sm:$0xf0] }
  0x93   : > { %2163 = vmatpush.bf16.msrb.mxu1 %v2989_v23  ;;  %v3968_v23 = vld [vmem:[#allocation6 + $0x49c] sm:$0xf0]  ;;  %v3869_v58 = vld [vmem:[#allocation6 + $0x18c] sm:$0xf] }
  0x94   : > { %2176 = vmatpush.bf16.msrb.mxu2 %v3181_v24  ;;  %v3612_v24 = vld [vmem:[#allocation6 + $0x758] sm:$0xf] }
  0x95   : > { %2189 = vmatpush.bf16.msrb.mxu3 %v3373_v28  ;;  %v4106_v28 = vld [vmem:[#allocation6 + $0x8ec] sm:$0xf0] }
  0x96   : > { %2151 = vmatpush.bf16.msrb.mxu0 %v2773_v36  ;;  %v3038_v36 = vld [vmem:[#allocation6 + $0x2f0] sm:$0xf0]  ;;  %v3805_v39 = vor.u32 %v4106_v28, %v3804_v26  ;;  %v4028_v26 = vld [vmem:[#allocation6 + $0x67c] sm:$0xf0] }
  0x97   : > { %2164 = vmatpush.bf16.msrb.mxu1 %v2965_v37  ;;  %v3253_v37 = vor.u32 %v3968_v23, %v3252_v22  ;;  %v3041_v44 = vor.u32 %v3911_v35, %v3038_v36  ;;  %v3517_v22 = vor.u32 %v4034_v10, %v3516_v9  ;;  %v2918_v35 = vld [vmem:[#allocation6 + $0x200] sm:$0xf0]  ;;  %v4001_v9 = vld [vmem:[#allocation6 + $0x5ac] sm:$0xf] }
  0x98   : > { %2177 = vmatpush.bf16.msrb.mxu2 %v3157_v38  ;;  %v3613_v38 = vor.u32 %v4058_v25, %v3612_v24  ;;  %v2753_v24 = vor.u32 %v3839_v18, %v2750_v19  ;;  %v3492_v25 = vld [vmem:[#allocation6 + $0x668] sm:$0xf]  ;;  %v4097_v18 = vld [vmem:[#allocation6 + $0x8ac] sm:$0xf]  ;;  %v3782_v19 = vld [vmem:[#allocation6 + $0x8c0] sm:$0xf0] }
  0x99   : > { %2190 = vmatpush.bf16.msrb.mxu3 %v3349_v42  ;;  %v4052_v42 = vld [vmem:[#allocation6 + $0x73c] sm:$0xf0]  ;;  %v3493_v36 = vor.u32 %v4028_v26, %v3492_v25  ;;  %v3995_v25 = vld [vmem:[#allocation6 + $0x57c] sm:$0xf]  ;;  %v3785_v26 = vor.u32 %v4097_v18, %v3782_v19  ;;  %v3470_v18 = vld [vmem:[#allocation6 + $0x650] sm:$0xf0] }
  0x9a   : > { %2152 = vmatpush.bf16.msrb.mxu0 %v2749_v48  ;;  %v3905_v48 = vld [vmem:[#allocation6 + $0x2ac] sm:$0xf]  ;;  %v4067_v19 = vld [vmem:[#allocation6 + $0x7bc] sm:$0xf] }
  0x9b   : > { %2165 = vmatpush.bf16.msrb.mxu1 %v2941_v49  ;;  %v3014_v49 = vld [vmem:[#allocation6 + $0x2c0] sm:$0xf0] }
  0x9c   : > { %2178 = vmatpush.bf16.msrb.mxu2 %v3133_v50  ;;  %v3589_v50 = vor.u32 %v4052_v42, %v3588_v41  ;;  %v3017_v56 = vor.u32 %v3905_v48, %v3014_v49  ;;  %v3660_v41 = vld [vmem:[#allocation6 + $0x7b8] sm:$0xf]  ;;  %v3444_v49 = vld [vmem:[#allocation6 + $0x608] sm:$0xf] }
  0x9d   : > { %2191 = vmatpush.bf16.msrb.mxu3 %v3325_v54  ;;  %v4046_v54 = vld [vmem:[#allocation6 + $0x70c] sm:$0xf0] }
  0x9e   : > { %2153 = vmatpush.bf16.msrb.mxu0 %v2725_v60  ;;  %v3899_v60 = vld [vmem:[#allocation6 + $0x27c] sm:$0xf] }
  0x9f   : > { %2166 = vmatpush.bf16.msrb.mxu1 %v2917_v61  ;;  %v2990_v61 = vld [vmem:[#allocation6 + $0x290] sm:$0xf0] }
  0xa0   : > { %2179 = vmatpush.bf16.msrb.mxu2 %v3109_v62  ;;  %v3565_v62 = vor.u32 %v4046_v54, %v3564_v53  ;;  %v2993_v4 = vor.u32 %v3899_v60, %v2990_v61  ;;  %v3636_v53 = vld [vmem:[#allocation6 + $0x788] sm:$0xf]  ;;  %v4064_v54 = vld [vmem:[#allocation6 + $0x79c] sm:$0xf0]  ;;  %v3959_v60 = vld [vmem:[#allocation6 + $0x45c] sm:$0xf] }
  0xa1   : > { %2192 = vmatpush.bf16.msrb.mxu3 %v3301_v2  ;;  %v4040_v2 = vld [vmem:[#allocation6 + $0x6dc] sm:$0xf0]  ;;  %v3230_v61 = vld [vmem:[#allocation6 + $0x470] sm:$0xf0] }
  0xa2   : > { %2154 = vmatpush.bf16.msrb.mxu0 %v2701_v8 }
  0xa3   : > { %2167 = vmatpush.bf16.msrb.mxu1 %v2893_v11  ;;  %v3708_v11 = vld [vmem:[#allocation6 + $0x818] sm:$0xf] }
  0xa4   : > { %2180 = vmatpush.bf16.msrb.mxu2 %v3085_v12  ;;  %v3709_v23 = vor.u32 %v4082_v15, %v3708_v11  ;;  %v3398_v11 = vld [vmem:[#allocation6 + $0x5c0] sm:$0xf0] }
  0xa5   : > { %2193 = vmatpush.bf16.msrb.mxu3 %v3277_v20  ;;  %v3887_v20 = vld [vmem:[#allocation6 + $0x21c] sm:$0xf]  ;;  %v3590_v15 = vld [vmem:[#allocation6 + $0x740] sm:$0xf0] }
  0xa6   : > { %2155 = vmatpush.bf16.msrb.mxu0 %v2677_v27  ;;  %v3684_v27 = vld [vmem:[#allocation6 + $0x7e8] sm:$0xf]  ;;  %v2945_v28 = vor.u32 %v3887_v20, %v2942_v21  ;;  %v3401_v21 = vor.u32 %v4001_v9, %v3398_v11  ;;  %v3086_v9 = vld [vmem:[#allocation6 + $0x350] sm:$0xf0] }
  0xa7   : > { %2168 = vmatpush.bf16.msrb.mxu1 %v2869_v33  ;;  %v2726_v33 = vld [vmem:[#allocation6 + $0x80] sm:$0xf0] }
  0xa8   : > { %2181 = vmatpush.bf16.msrb.mxu2 %v3061_v34  ;;  %v3881_v34 = vld [vmem:[#allocation6 + $0x1ec] sm:$0xf] }
  0xa9   : > { %2194 = vmatpush.bf16.msrb.mxu3 %v3253_v37  ;;  %2156 = vmatmul.bf16.vlgmr.msrb.gmra.mxu0 %v4523_v13  ;;  %v4088_v13 = vld [vmem:[#allocation6 + $0x85c] sm:$0xf0]  ;;  %v3685_v37 = vor.u32 %v4076_v30, %v3684_v27  ;;  %v2921_v42 = vor.u32 %v3881_v34, %v2918_v35  ;;  %v3374_v27 = vld [vmem:[#allocation6 + $0x590] sm:$0xf0] }
  0xaa   : > { %2200 = vmatpush.bf16.msra.mxu0 %v3613_v38  ;;  %2169 = vmatmul.bf16.vlgmr.msrb.gmra.mxu1 %v4525_v14  ;;  %v2966_v14 = vld [vmem:[#allocation6 + $0x260] sm:$0xf0]  ;;  %v3733_v8 = vor.u32 %v4088_v13, %v3732_v3  ;;  %v2729_v38 = vor.u32 %v3833_v32, %v2726_v33  ;;  %v3637_v3 = vor.u32 %v4064_v54, %v3636_v53  ;;  %v4103_v13 = vld [vmem:[#allocation6 + $0x8dc] sm:$0xf]  ;;  %v3566_v30 = vld [vmem:[#allocation6 + $0x710] sm:$0xf0] }
  0xab   : > { %2213 = vmatpush.bf16.msra.mxu1 %v3805_v39  ;;  %2182 = vmatmul.bf16.vlgmr.msrb.gmra.mxu2 %v4528_v16  ;;  %v3541_v16 = vor.u32 %v4040_v2, %v3540_v1  ;;  %v2969_v12 = vor.u32 %v3893_v7, %v2966_v14  ;;  %v3468_v39 = vld [vmem:[#allocation6 + $0x638] sm:$0xf]  ;;  %v4055_v1 = vld [vmem:[#allocation6 + $0x75c] sm:$0xf]  ;;  %v3614_v2 = vld [vmem:[#allocation6 + $0x770] sm:$0xf0]  ;;  %v3233_v7 = vor.u32 %v3959_v60, %v3230_v61 }
  0xac   : > { %2226 = vmatpush.bf16.msra.mxu2 %v2849_v40  ;;  %2195 = vmatmul.bf16.vlgmr.msrb.gmra.mxu3 %v4530_v17  ;;  %v2777_v17 = vor.u32 %v3845_v5, %v2774_v6  ;;  %v4022_v40 = vld [vmem:[#allocation6 + $0x64c] sm:$0xf0]  ;;  %v3806_v5 = vld [vmem:[#allocation6 + $0x8f0] sm:$0xf0]  ;;  %v2873_v6 = vor.u32 %v3869_v58, %v2870_v59  ;;  %v4091_v32 = vld [vmem:[#allocation6 + $0x87c] sm:$0xf] }
  0xad   : > { %2239 = vmatpush.bf16.msra.mxu3 %v3041_v44  ;;  %v3827_v44 = vld [vmem:[#allocation6 + $0x3c] sm:$0xf]  ;;  %v3469_v48 = vor.u32 %v4022_v40, %v3468_v39  ;;  %v3809_v10 = vor.u32 %v4103_v13, %v3806_v5  ;;  %v3758_v33 = vld [vmem:[#allocation6 + $0x890] sm:$0xf0]  ;;  %v3158_v39 = vld [vmem:[#allocation6 + $0x3e0] sm:$0xf0] }
  0xae   : > { %2201 = vmatpush.bf16.msra.mxu0 %v3589_v50  ;;  %v4016_v50 = vld [vmem:[#allocation6 + $0x61c] sm:$0xf0]  ;;  %v3989_v40 = vld [vmem:[#allocation6 + $0x54c] sm:$0xf]  ;;  %v3326_v53 = vld [vmem:[#allocation6 + $0x530] sm:$0xf0] }
  0xaf   : > { %2214 = vmatpush.bf16.msra.mxu1 %v3781_v51  ;;  %v3661_v51 = vor.u32 %v4070_v43, %v3660_v41  ;;  %v4554_v34 = vld.sshfl [vmem:[#allocation1] sm:$0xff pattern:$0x73625140]  ;;  %v3350_v41 = vld [vmem:[#allocation6 + $0x560] sm:$0xf0] }
  0xb0   : > { %2227 = vmatpush.bf16.msra.mxu2 %v2825_v52  ;;  %v2705_v52 = vor.u32 %v3827_v44, %v2702_v45  ;;  %v3542_v43 = vld [vmem:[#allocation6 + $0x6e0] sm:$0xf0]  ;;  %v4085_v44 = vld [vmem:[#allocation6 + $0x84c] sm:$0xf]  ;;  %v4031_v54 = vld [vmem:[#allocation6 + $0x69c] sm:$0xf] }
  0xb1   : > { %2240 = vmatpush.bf16.msra.mxu3 %v3017_v56  ;;  %v2897_v56 = vor.u32 %v3875_v46, %v2894_v47  ;;  %v3734_v45 = vld [vmem:[#allocation6 + $0x860] sm:$0xf0]  ;;  %v3353_v47 = vor.u32 %v3989_v40, %v3350_v41  ;;  %v3929_v61 = vld [vmem:[#allocation6 + $0x36c] sm:$0xf]  ;;  %v3867_v40 = vld [vmem:[#allocation6 + $0x174] sm:$0xf0] }
  0xb2   : > { %2202 = vmatpush.bf16.msra.mxu0 %v3565_v62  ;;  %v4007_v62 = vld [vmem:[#allocation6 + $0x5dc] sm:$0xf]  ;;  %v4073_v13 = vld [vmem:[#allocation6 + $0x7ec] sm:$0xf]  ;;  %v3686_v5 = vld [vmem:[#allocation6 + $0x800] sm:$0xf0] }
  0xb3   : > { %2215 = vmatpush.bf16.msra.mxu1 %v3757_v63  ;;  %v3445_v63 = vor.u32 %v4016_v50, %v3444_v49  ;;  %v3935_v49 = vld [vmem:[#allocation6 + $0x39c] sm:$0xf]  ;;  %v3134_v50 = vld [vmem:[#allocation6 + $0x3b0] sm:$0xf0]  ;;  %v3689_v11 = vor.u32 %v4073_v13, %v3686_v5  ;;  %v2804_v5 = vld [vmem:[#allocation6 + $0x100] sm:$0xf] }
  0xb4   : > { %2228 = vmatpush.bf16.msra.mxu2 %v2801_v0  ;;  %v3422_v0 = vld [vmem:[#allocation6 + $0x5f0] sm:$0xf0]  ;;  %v3137_v58 = vor.u32 %v3935_v49, %v3134_v50  ;;  %v3428_v49 = vld [vmem:[#allocation6 + $0x5e0] sm:$0xf]  ;;  %v4011_v50 = vld [vmem:[#allocation6 + $0x5f4] sm:$0xf0] }
  0xb5   : > { %2241 = vmatpush.bf16.msra.mxu3 %v2993_v4  ;;  %v2681_v4 = vor.u32 %v3821_v55, %v2678_v57  ;;  %v3425_v14 = vor.u32 %v4007_v62, %v3422_v0  ;;  %v3518_v55 = vld [vmem:[#allocation6 + $0x6b0] sm:$0xf0]  ;;  %v3110_v62 = vld [vmem:[#allocation6 + $0x380] sm:$0xf0] }
  0xb6   : > { %2203 = vmatpush.bf16.msra.mxu0 %v3541_v16  ;;  %v3617_v16 = vor.u32 %v4055_v1, %v3614_v2  ;;  %v3710_v57 = vld [vmem:[#allocation6 + $0x830] sm:$0xf0]  ;;  %v3521_v60 = vor.u32 %v4031_v54, %v3518_v55  ;;  %v3302_v2 = vld [vmem:[#allocation6 + $0x500] sm:$0xf0] }
  0xb7   : > { %2216 = vmatpush.bf16.msra.mxu1 %v3733_v8  ;;  %v3953_v8 = vld [vmem:[#allocation6 + $0x42c] sm:$0xf] }
  0xb8   : > { %2229 = vmatpush.bf16.msra.mxu2 %v2777_v17  ;;  %v3206_v17 = vld [vmem:[#allocation6 + $0x440] sm:$0xf0] }
  0xb9   : > { %2242 = vmatpush.bf16.msra.mxu3 %v2969_v12  ;;  %v4049_v12 = vld [vmem:[#allocation6 + $0x72c] sm:$0xf]  ;;  %v3209_v20 = vor.u32 %v3953_v8, %v3206_v17  ;;  %v3923_v17 = vld [vmem:[#allocation6 + $0x33c] sm:$0xf] }
  0xba   : > { %2204 = vmatpush.bf16.msra.mxu0 %v3517_v22  ;;  %v3593_v22 = vor.u32 %v4049_v12, %v3590_v15  ;;  %v3278_v12 = vld [vmem:[#allocation6 + $0x4d0] sm:$0xf0]  ;;  %v4019_v15 = vld [vmem:[#allocation6 + $0x63c] sm:$0xf] }
  0xbb   : > { %2217 = vmatpush.bf16.msra.mxu1 %v3709_v23  ;;  %v3947_v23 = vld [vmem:[#allocation6 + $0x3fc] sm:$0xf] }
  0xbc   : > { %2230 = vmatpush.bf16.msra.mxu2 %v2753_v24  ;;  %v3182_v24 = vld [vmem:[#allocation6 + $0x410] sm:$0xf0] }
  0xbd   : > { %2243 = vmatpush.bf16.msra.mxu3 %v2945_v28  ;;  %v4043_v28 = vld [vmem:[#allocation6 + $0x6fc] sm:$0xf]  ;;  %v3185_v35 = vor.u32 %v3947_v23, %v3182_v24  ;;  %v3062_v23 = vld [vmem:[#allocation6 + $0x320] sm:$0xf0] }
  0xbe   : > { %2205 = vmatpush.bf16.msra.mxu0 %v3493_v36  ;;  %v4557_v36 = vld.sshfl [vmem:[#allocation1 + $0x8] sm:$0xff pattern:$0x73625140] }
  0xbf   : > { %2218 = vmatpush.bf16.msra.mxu1 %v3685_v37  ;;  %v3569_v37 = vor.u32 %v4043_v28, %v3566_v30  ;;  %v4013_v28 = vld [vmem:[#allocation6 + $0x60c] sm:$0xf] }
  0xc0   : > { %2231 = vmatpush.bf16.msra.mxu2 %v2729_v38  ;;  %v3941_v38 = vld [vmem:[#allocation6 + $0x3cc] sm:$0xf] }
  0xc1   : > { %2244 = vmatpush.bf16.msra.mxu3 %v2921_v42  ;;  %v4037_v42 = vld [vmem:[#allocation6 + $0x6cc] sm:$0xf]  ;;  %v3161_v46 = vor.u32 %v3941_v38, %v3158_v39  ;;  %v2852_v39 = vld [vmem:[#allocation6 + $0x160] sm:$0xf] }
  0xc2   : > { %2206 = vmatpush.bf16.msra.mxu0 %v3469_v48  ;;  %v3545_v48 = vor.u32 %v4037_v42, %v3542_v43 }
  0xc3   : > { %2219 = vmatpush.bf16.msra.mxu1 %v3661_v51  ;;  %v3983_v51 = vld [vmem:[#allocation6 + $0x51c] sm:$0xf] }
  0xc4   : > { %2232 = vmatpush.bf16.msra.mxu2 %v2705_v52  ;;  %v3737_v52 = vor.u32 %v4085_v44, %v3734_v45  ;;  %v3329_v59 = vor.u32 %v3983_v51, %v3326_v53  ;;  %v3915_v44 = vld [vmem:[#allocation6 + $0x2f4] sm:$0xf0]  ;;  %v3236_v45 = vld [vmem:[#allocation6 + $0x460] sm:$0xf]  ;;  %v2853_v53 = vor.u32 %v3867_v40, %v2852_v39 }
  0xc5   : > { %2245 = vmatpush.bf16.msra.mxu3 %v2897_v56  ;;  %v4079_v56 = vld [vmem:[#allocation6 + $0x81c] sm:$0xf]  ;;  %v2756_v40 = vld [vmem:[#allocation6 + $0xa0] sm:$0xf] }
  0xc6   : > { %2207 = vmatpush.bf16.msra.mxu0 %v3445_v63  ;;  %v3977_v63 = vld [vmem:[#allocation6 + $0x4ec] sm:$0xf]  ;;  %v3713_v1 = vor.u32 %v4079_v56, %v3710_v57  ;;  %v2828_v56 = vld [vmem:[#allocation6 + $0x130] sm:$0xf]  ;;  %v3861_v57 = vld [vmem:[#allocation6 + $0x144] sm:$0xf0] }
  0xc7   : > { %2220 = vmatpush.bf16.msra.mxu1 %v3637_v3  ;;  %v2014_v0 = vpop.f32.mrf.mxu1  ;;  %v4025_v3 = vld [vmem:[#allocation6 + $0x66c] sm:$0xf] }
  0xc8   : > { %2233 = vmatpush.bf16.msra.mxu2 %v2681_v4  ;;  %v3494_v4 = vld [vmem:[#allocation6 + $0x680] sm:$0xf0] }
  0xc9   : > { %2246 = vmatpush.bf16.msra.mxu3 %v2873_v6  ;;  %2208 = vmatmul.bf16.vlgmr.msra.gmra.mxu0 %v4536_v29  ;;  %v3377_v29 = vor.u32 %v3995_v25, %v3374_v27  ;;  %v2001_v6 = vpop.f32.mrf.mxu0  ;;  %v3497_v8 = vor.u32 %v4025_v3, %v3494_v4  ;;  %v3473_v25 = vor.u32 %v4019_v15, %v3470_v18  ;;  %v3254_v27 = vld [vmem:[#allocation6 + $0x4a0] sm:$0xf0]  ;;  %v3999_v15 = vld [vmem:[#allocation6 + $0x594] sm:$0xf0] }
  0xca   : > { %2252 = vmatpush.bf16.msrb.mxu0 %v3233_v7  ;;  %2221 = vmatmul.bf16.vlgmr.msra.gmra.mxu1 %v4538_v31  ;;  %v3761_v31 = vor.u32 %v4091_v32, %v3758_v33  ;;  %v3113_v7 = vor.u32 %v3929_v61, %v3110_v62  ;;  %v3446_v33 = vld [vmem:[#allocation6 + $0x620] sm:$0xf0]  ;;  %v3212_v61 = vld [vmem:[#allocation6 + $0x430] sm:$0xf]  ;;  %v3957_v62 = vld [vmem:[#allocation6 + $0x444] sm:$0xf0] }
  0xcb   : > { %2265 = vmatpush.bf16.msrb.mxu1 %v3425_v14  ;;  %2234 = vmatmul.bf16.vlgmr.msra.gmra.mxu2 %v4554_v34  ;;  %v2015_v14 = vadd.f32 %v2014_v0, %v2001_v6  ;;  %v4005_v0 = vld [vmem:[#allocation6 + $0x5c4] sm:$0xf0]  ;;  %v3213_v13 = vor.u32 %v3957_v62, %v3212_v61  ;;  %v3855_v6 = vld [vmem:[#allocation6 + $0x114] sm:$0xf0] }
  0xcc   : > { %2278 = vmatpush.bf16.msrb.mxu2 %v3617_v16  ;;  %2247 = vmatmul.bf16.vlgmr.msra.gmra.mxu3 %v4557_v36  ;;  %v3305_v16 = vor.u32 %v3977_v63, %v3302_v2  ;;  %v3404_v63 = vld [vmem:[#allocation6 + $0x5b0] sm:$0xf]  ;;  %v3981_v61 = vld [vmem:[#allocation6 + $0x504] sm:$0xf0] }
  0xcd   : > { %2291 = vmatpush.bf16.msrb.mxu3 %v3809_v10  ;;  %v3971_v10 = vld [vmem:[#allocation6 + $0x4bc] sm:$0xf]  ;;  %v4571_v18 = vld.sshfl [vmem:[#allocation1 + $0x18] sm:$0xff pattern:$0x73625140] }
  0xce   : > { %2253 = vmatpush.bf16.msrb.mxu0 %v3209_v20  ;;  %v3662_v20 = vld [vmem:[#allocation6 + $0x7d0] sm:$0xf0]  ;;  %v3281_v24 = vor.u32 %v3971_v10, %v3278_v12  ;;  %v4565_v10 = vld.sshfl [vmem:[#allocation1 + $0x10] sm:$0xff pattern:$0x73625140] }
  0xcf   : > { %2266 = vmatpush.bf16.msrb.mxu1 %v3401_v21  ;;  %v3089_v21 = vor.u32 %v3923_v17, %v3086_v9  ;;  %v2016_v30 = vpop.f32.mrf.mxu1  ;;  %v3665_v32 = vor.u32 %v4067_v19, %v3662_v20  ;;  %v2040_v38 = vpop.f32.mrf.mxu3  ;;  %v3188_v17 = vld [vmem:[#allocation6 + $0x400] sm:$0xf]  ;;  %v3951_v9 = vld [vmem:[#allocation6 + $0x414] sm:$0xf0]  ;;  %v2805_v19 = vor.u32 %v3855_v6, %v2804_v5 }
  0xd0   : > { %2279 = vmatpush.bf16.msrb.mxu2 %v3593_v22  ;;  %v3917_v22 = vld [vmem:[#allocation6 + $0x30c] sm:$0xf]  ;;  %v3380_v12 = vld [vmem:[#allocation6 + $0x580] sm:$0xf]  ;;  %v3831_v5 = vld [vmem:[#allocation6 + $0x54] sm:$0xf0] }
  0xd1   : > { %2292 = vmatpush.bf16.msrb.mxu3 %v3785_v26  ;;  %v3965_v26 = vld [vmem:[#allocation6 + $0x48c] sm:$0xf]  ;;  %v2003_v41 = vpop.f32.mrf.mxu0  ;;  %v3065_v43 = vor.u32 %v3917_v22, %v3062_v23  ;;  %v2780_v22 = vld [vmem:[#allocation6 + $0xd0] sm:$0xf]  ;;  %v3849_v23 = vld [vmem:[#allocation6 + $0xe4] sm:$0xf0] }
  0xd2   : > { %2254 = vmatpush.bf16.msrb.mxu0 %v3185_v35  ;;  %v4061_v35 = vld [vmem:[#allocation6 + $0x78c] sm:$0xf]  ;;  %v2948_v41 = vld [vmem:[#allocation6 + $0x220] sm:$0xf] }
  0xd3   : > { %2267 = vmatpush.bf16.msrb.mxu1 %v3377_v29  ;;  %v3638_v29 = vld [vmem:[#allocation6 + $0x7a0] sm:$0xf0]  ;;  %v2900_v6 = vld [vmem:[#allocation6 + $0x1c0] sm:$0xf] }
  0xd4   : > { %2280 = vmatpush.bf16.msrb.mxu2 %v3569_v37  ;;  %v2027_v37 = vpop.f32.mrf.mxu2 }
  0xd5   : > { %2293 = vmatpush.bf16.msrb.mxu3 %v3761_v31  ;;  %v3044_v31 = vld [vmem:[#allocation6 + $0x2e0] sm:$0xf]  ;;  %v2028_v42 = vadd.f32 %v2027_v37, %v2015_v14 }
  0xd6   : > { %2255 = vmatpush.bf16.msrb.mxu0 %v3161_v46  ;;  %v3963_v46 = vld [vmem:[#allocation6 + $0x474] sm:$0xf0]  ;;  %v3045_v54 = vor.u32 %v3915_v44, %v3044_v31 }
  0xd7   : > { %2268 = vmatpush.bf16.msrb.mxu1 %v3353_v47  ;;  %v3257_v47 = vor.u32 %v3965_v26, %v3254_v27  ;;  %v4560_v51 = vadd.f32 %v2040_v38, %v2028_v42  ;;  %v3237_v55 = vor.u32 %v3963_v46, %v3236_v45  ;;  %v2042_v3 = vpop.f32.mrf.mxu3  ;;  %v4562_v14 = vld.sshfl [vmem:[#allocation1 + $0x20] sm:$0xff pattern:$0x73625140]  ;;  %v3897_v26 = vld [vmem:[#allocation6 + $0x264] sm:$0xf0] }
  0xd8   : > { %2281 = vmatpush.bf16.msrb.mxu2 %v3545_v48  ;;  %v3449_v48 = vor.u32 %v4013_v28, %v3446_v33  ;;  %v3164_v27 = vld [vmem:[#allocation6 + $0x3d0] sm:$0xf]  ;;  %v3945_v28 = vld [vmem:[#allocation6 + $0x3e4] sm:$0xf0]  ;;  %v3843_v31 = vld [vmem:[#allocation6 + $0xb4] sm:$0xf0] }
  0xd9   : > { %2294 = vmatpush.bf16.msrb.mxu3 %v3737_v52  ;;  %v3641_v52 = vor.u32 %v4061_v35, %v3638_v29  ;;  %v3993_v33 = vld [vmem:[#allocation6 + $0x564] sm:$0xf0]  ;;  %v2781_v29 = vor.u32 %v3849_v23, %v2780_v22  ;;  %v3165_v39 = vor.u32 %v3945_v28, %v3164_v27  ;;  %v3891_v44 = vld [vmem:[#allocation6 + $0x234] sm:$0xf0]  ;;  %v3140_v45 = vld [vmem:[#allocation6 + $0x3a0] sm:$0xf] }
  0xda   : > { %2256 = vmatpush.bf16.msrb.mxu0 %v3137_v58  ;;  %v3020_v58 = vld [vmem:[#allocation6 + $0x2b0] sm:$0xf]  ;;  %v3939_v46 = vld [vmem:[#allocation6 + $0x3b4] sm:$0xf0]  ;;  %v3921_v27 = vld [vmem:[#allocation6 + $0x324] sm:$0xf0] }
  0xdb   : > { %2269 = vmatpush.bf16.msrb.mxu1 %v3329_v59  ;;  %v3429_v59 = vor.u32 %v4011_v50, %v3428_v49  ;;  %v2757_v49 = vor.u32 %v3843_v31, %v2756_v40  ;;  %v2949_v50 = vor.u32 %v3891_v44, %v2948_v41  ;;  %v2876_v23 = vld [vmem:[#allocation6 + $0x190] sm:$0xf]  ;;  %v3864_v40 = vld [vmem:[#allocation6 + $0x164] sm:$0xf]  ;;  %v2854_v31 = vld [vmem:[#allocation6 + $0x178] sm:$0xf0] }
  0xdc   : > { %2282 = vmatpush.bf16.msrb.mxu2 %v3521_v60  ;;  %v3909_v60 = vld [vmem:[#allocation6 + $0x2c4] sm:$0xf0]  ;;  %v2029_v2 = vpop.f32.mrf.mxu2  ;;  %v3260_v28 = vld [vmem:[#allocation6 + $0x490] sm:$0xf]  ;;  %v3912_v44 = vld [vmem:[#allocation6 + $0x2e4] sm:$0xf] }
  0xdd   : > { %2295 = vmatpush.bf16.msrb.mxu3 %v3713_v1  ;;  %v2829_v1 = vor.u32 %v3861_v57, %v2828_v56  ;;  %v3021_v4 = vor.u32 %v3909_v60, %v3020_v58  ;;  %v3885_v56 = vld [vmem:[#allocation6 + $0x204] sm:$0xf0]  ;;  %v3116_v57 = vld [vmem:[#allocation6 + $0x370] sm:$0xf] }
  0xde   : > { %2257 = vmatpush.bf16.msrb.mxu0 %v3113_v7  ;;  %v2996_v7 = vld [vmem:[#allocation6 + $0x280] sm:$0xf]  ;;  %v3933_v58 = vld [vmem:[#allocation6 + $0x384] sm:$0xf0]  ;;  %v3308_v60 = vld [vmem:[#allocation6 + $0x4f0] sm:$0xf] }
  0xdf   : > { %2270 = vmatpush.bf16.msrb.mxu1 %v3305_v16  ;;  %v3405_v16 = vor.u32 %v4005_v0, %v3404_v63 }
  0xe0   : > { %2283 = vmatpush.bf16.msrb.mxu2 %v3497_v8  ;;  %v3903_v8 = vld [vmem:[#allocation6 + $0x294] sm:$0xf0] }
  0xe1   : > { %2296 = vmatpush.bf16.msrb.mxu3 %v3689_v11  ;;  %v4568_v11 = vld.sshfl [vmem:[#allocation1 + $0x28] sm:$0xff pattern:$0x73625140]  ;;  %v2997_v20 = vor.u32 %v3903_v8, %v2996_v7  ;;  %v3309_v7 = vor.u32 %v3981_v61, %v3308_v60 }
  0xe2   : > { %2258 = vmatpush.bf16.msrb.mxu0 %v3089_v21  ;;  %v3189_v21 = vor.u32 %v3951_v9, %v3188_v17  ;;  %v3092_v8 = vld [vmem:[#allocation6 + $0x340] sm:$0xf]  ;;  %v3927_v17 = vld [vmem:[#allocation6 + $0x354] sm:$0xf0] }
  0xe3   : > { %2271 = vmatpush.bf16.msrb.mxu1 %v3281_v24  ;;  %v2972_v24 = vld [vmem:[#allocation6 + $0x250] sm:$0xf]  ;;  %v3284_v9 = vld [vmem:[#allocation6 + $0x4c0] sm:$0xf]  ;;  %v3093_v22 = vor.u32 %v3927_v17, %v3092_v8 }
  0xe4   : > { %2284 = vmatpush.bf16.msrb.mxu2 %v3473_v25  ;;  %v3381_v25 = vor.u32 %v3999_v15, %v3380_v12  ;;  %v2973_v38 = vor.u32 %v3897_v26, %v2972_v24  ;;  %v3975_v12 = vld [vmem:[#allocation6 + $0x4d4] sm:$0xf0]  ;;  %v3873_v24 = vld [vmem:[#allocation6 + $0x1a4] sm:$0xf0]  ;;  %v3548_v17 = vld [vmem:[#allocation6 + $0x6d0] sm:$0xf] }
  0xe5   : > { %2297 = vmatpush.bf16.msrb.mxu3 %v3665_v32  ;;  %v3356_v32 = vld [vmem:[#allocation6 + $0x550] sm:$0xf]  ;;  %v3285_v26 = vor.u32 %v3975_v12, %v3284_v9  ;;  %v2877_v41 = vor.u32 %v3873_v24, %v2876_v23  ;;  %v4041_v9 = vld [vmem:[#allocation6 + $0x6e4] sm:$0xf0]  ;;  %v2974_v23 = vld [vmem:[#allocation6 + $0x268] sm:$0xf0] }
  0xe6   : > { %2259 = vmatpush.bf16.msrb.mxu0 %v3065_v43  ;;  %v2053_v30 = vpop.f32.mrf.mxu0  ;;  %v3357_v42 = vor.u32 %v3993_v33, %v3356_v32  ;;  %v3620_v33 = vld [vmem:[#allocation6 + $0x760] sm:$0xf]  ;;  %v3740_v12 = vld [vmem:[#allocation6 + $0x850] sm:$0xf] }
  0xe7   : > { %2272 = vmatpush.bf16.msrb.mxu1 %v3257_v47  ;;  %v2054_v35 = vadd.f32 %v2053_v30, %v4560_v51  ;;  %v2066_v37 = vpop.f32.mrf.mxu1  ;;  %v3332_v47 = vld [vmem:[#allocation6 + $0x520] sm:$0xf]  ;;  %v3141_v51 = vor.u32 %v3939_v46, %v3140_v45  ;;  %v3969_v30 = vld [vmem:[#allocation6 + $0x4a4] sm:$0xf0]  ;;  %v3046_v45 = vld [vmem:[#allocation6 + $0x2f8] sm:$0xf0] }
  0xe8   : > { %2285 = vmatpush.bf16.msrb.mxu2 %v3449_v48  ;;  %v3987_v48 = vld [vmem:[#allocation6 + $0x534] sm:$0xf0]  ;;  %v3261_v46 = vor.u32 %v3969_v30, %v3260_v28 }
  0xe9   : > { %2298 = vmatpush.bf16.msrb.mxu3 %v3641_v52  ;;  %2260 = vmatmul.bf16.vlgmr.msrb.gmra.mxu0 %v4565_v10  ;;  %v4575_v43 = vadd.f32 %v2066_v37, %v2054_v35  ;;  %v2732_v52 = vld [vmem:[#allocation6 + $0x70] sm:$0xf]  ;;  %v4059_v35 = vld [vmem:[#allocation6 + $0x774] sm:$0xf0] }
  0xea   : > { %2304 = vmatpush.bf16.msra.mxu0 %v2853_v53  ;;  %2273 = vmatmul.bf16.vlgmr.msrb.gmra.mxu1 %v4571_v18  ;;  %v3837_v53 = vld [vmem:[#allocation6 + $0x84] sm:$0xf0] }
  0xeb   : > { %2317 = vmatpush.bf16.msra.mxu1 %v3045_v54  ;;  %2286 = vmatmul.bf16.vlgmr.msrb.gmra.mxu2 %v4562_v14  ;;  %v2924_v54 = vld [vmem:[#allocation6 + $0x1f0] sm:$0xf]  ;;  %v2733_v0 = vor.u32 %v3837_v53, %v2732_v52  ;;  %v3049_v53 = vor.u32 %v3912_v44, %v3046_v45  ;;  %v2462_v24 = vsel %vm2461_vm0, %v4575_v43, 0.0 }
  0xec   : > { %2330 = vmatpush.bf16.msra.mxu2 %v3237_v55  ;;  %2299 = vmatmul.bf16.vlgmr.msrb.gmra.mxu3 %v4568_v11  ;;  %v3333_v55 = vor.u32 %v3987_v48, %v3332_v47  ;;  %v2925_v3 = vor.u32 %v3885_v56, %v2924_v54  ;;  %v3621_v47 = vor.u32 %v4059_v35, %v3620_v33  ;;  %v3788_v52 = vld [vmem:[#allocation6 + $0x8b0] sm:$0xf]  ;;  %v4101_v54 = vld [vmem:[#allocation6 + $0x8c4] sm:$0xf0]  ;;  %v2830_v56 = vld [vmem:[#allocation6 + $0x148] sm:$0xf0] }
  0xed   : > { %2343 = vmatpush.bf16.msra.mxu3 %v3429_v59  ;;  %v3789_v60 = vor.u32 %v4101_v54, %v3788_v52  ;;  %v3524_v33 = vld [vmem:[#allocation6 + $0x6a0] sm:$0xf]  ;;  %v4035_v35 = vld [vmem:[#allocation6 + $0x6b4] sm:$0xf0]  ;;  %v3834_v54 = vld [vmem:[#allocation6 + $0x74] sm:$0xf] }
  0xee   : > { %2305 = vmatpush.bf16.msra.mxu0 %v2829_v1  ;;  %v2079_v59 = vpop.f32.mrf.mxu2  ;;  %v2055_v63 = vpop.f32.mrf.mxu0  ;;  %v3525_v44 = vor.u32 %v4035_v35, %v3524_v33  ;;  %v2878_v33 = vld [vmem:[#allocation6 + $0x1a8] sm:$0xf0]  ;;  %v3960_v35 = vld [vmem:[#allocation6 + $0x464] sm:$0xf] }
  0xef   : > { %2318 = vmatpush.bf16.msra.mxu1 %v3021_v4  ;;  %v2092_v62 = vpop.f32.mrf.mxu3  ;;  %v2068_v2 = vpop.f32.mrf.mxu1  ;;  %v3117_v4 = vor.u32 %v3933_v58, %v3116_v57  ;;  %v3906_v57 = vld [vmem:[#allocation6 + $0x2b4] sm:$0xf]  ;;  %v3022_v58 = vld [vmem:[#allocation6 + $0x2c8] sm:$0xf0]  ;;  %v4047_v63 = vld [vmem:[#allocation6 + $0x714] sm:$0xf0] }
  0xf0   : > { %2331 = vmatpush.bf16.msra.mxu2 %v3213_v13  ;;  %v4577_v1 = vadd.f32 %v2092_v62, %v2079_v59  ;;  %v2708_v13 = vld [vmem:[#allocation6 + $0x40] sm:$0xf]  ;;  %v3025_v2 = vor.u32 %v3906_v57, %v3022_v58  ;;  %v3882_v57 = vld [vmem:[#allocation6 + $0x1f4] sm:$0xf]  ;;  %v2926_v58 = vld [vmem:[#allocation6 + $0x208] sm:$0xf0] }
  0xf1   : > { %2344 = vmatpush.bf16.msra.mxu3 %v3405_v16  ;;  %v3879_v16 = vld [vmem:[#allocation6 + $0x1d4] sm:$0xf0]  ;;  %v2709_v15 = vor.u32 %v3831_v5, %v2708_v13  ;;  %v3572_v62 = vld [vmem:[#allocation6 + $0x700] sm:$0xf]  ;;  %v2806_v13 = vld [vmem:[#allocation6 + $0x118] sm:$0xf0] }
  0xf2   : > { %2306 = vmatpush.bf16.msra.mxu0 %v2805_v19  ;;  %v2684_v19 = vld [vmem:[#allocation6 + $0x10] sm:$0xf]  ;;  %v3900_v5 = vld [vmem:[#allocation6 + $0x284] sm:$0xf] }
  0xf3   : > { %2319 = vmatpush.bf16.msra.mxu1 %v2997_v20  ;;  %v3825_v20 = vld [vmem:[#allocation6 + $0x24] sm:$0xf0] }
  0xf4   : > { %2332 = vmatpush.bf16.msra.mxu2 %v3189_v21  ;;  %v2901_v21 = vor.u32 %v3879_v16, %v2900_v6  ;;  %v2998_v6 = vld [vmem:[#allocation6 + $0x298] sm:$0xf0] }
  0xf5   : > { %2345 = vmatpush.bf16.msra.mxu3 %v3381_v25  ;;  %v3068_v25 = vld [vmem:[#allocation6 + $0x310] sm:$0xf] }
  0xf6   : > { %2307 = vmatpush.bf16.msra.mxu0 %v2781_v29  ;;  %v2081_v32 = vpop.f32.mrf.mxu2  ;;  %v3812_v29 = vld [vmem:[#allocation6 + $0x8e0] sm:$0xf] }
  0xf7   : > { %2320 = vmatpush.bf16.msra.mxu1 %v2973_v38  ;;  %v2094_v37 = vpop.f32.mrf.mxu3  ;;  %v2685_v38 = vor.u32 %v3825_v20, %v2684_v19  ;;  %v4089_v19 = vld [vmem:[#allocation6 + $0x864] sm:$0xf0]  ;;  %v3846_v20 = vld [vmem:[#allocation6 + $0xd4] sm:$0xf] }
  0xf8   : > { %2333 = vmatpush.bf16.msra.mxu2 %v3165_v39  ;;  %v4107_v39 = vld [vmem:[#allocation6 + $0x8f4] sm:$0xf0] }
  0xf9   : > { %2346 = vmatpush.bf16.msra.mxu3 %v3357_v42  ;;  %v3069_v42 = vor.u32 %v3921_v27, %v3068_v25  ;;  %v3813_v48 = vor.u32 %v4107_v39, %v3812_v29  ;;  %v3549_v25 = vor.u32 %v4041_v9, %v3548_v17  ;;  %v3741_v27 = vor.u32 %v4089_v19, %v3740_v12  ;;  %v3716_v29 = vld [vmem:[#allocation6 + $0x820] sm:$0xf]  ;;  %v3840_v39 = vld [vmem:[#allocation6 + $0xa4] sm:$0xf]  ;;  %v2902_v12 = vld [vmem:[#allocation6 + $0x1d8] sm:$0xf0] }
  0xfa   : > { %2308 = vmatpush.bf16.msra.mxu0 %v2757_v49  ;;  %v2857_v49 = vor.u32 %v3864_v40, %v2854_v31  ;;  %v2758_v40 = vld [vmem:[#allocation6 + $0xb8] sm:$0xf0]  ;;  %v2463_v31 = vrot.slane %v2462_v24, 4  ;;  %v3876_v9 = vld [vmem:[#allocation6 + $0x1c4] sm:$0xf] }
  0xfb   : > { %2321 = vmatpush.bf16.msra.mxu1 %v2949_v50  ;;  %v3596_v50 = vld [vmem:[#allocation6 + $0x730] sm:$0xf] }
  0xfc   : > { %2334 = vmatpush.bf16.msra.mxu2 %v3141_v51  ;;  %v4053_v51 = vld [vmem:[#allocation6 + $0x744] sm:$0xf0]  ;;  %v3452_v19 = vld [vmem:[#allocation6 + $0x610] sm:$0xf] }
  0xfd   : > { %2347 = vmatpush.bf16.msra.mxu3 %v3333_v55  ;;  %v3858_v55 = vld [vmem:[#allocation6 + $0x134] sm:$0xf]  ;;  %v3597_v59 = vor.u32 %v4053_v51, %v3596_v50 }
  0xfe   : > { %2309 = vmatpush.bf16.msra.mxu0 %v2733_v0  ;;  %v2833_v61 = vor.u32 %v3858_v55, %v2830_v56  ;;  %v3764_v0 = vld [vmem:[#allocation6 + $0x880] sm:$0xf]  ;;  %v2734_v55 = vld [vmem:[#allocation6 + $0x88] sm:$0xf0]  ;;  %v2464_v56 = vadd.f32 %v2463_v31, %v2462_v24 }
  0xff   : > { %2322 = vmatpush.bf16.msra.mxu1 %v2925_v3  ;;  %v4095_v3 = vld [vmem:[#allocation6 + $0x894] sm:$0xf0] }
 0x100   : > { %2335 = vmatpush.bf16.msra.mxu2 %v3117_v4  ;;  %v3852_v4 = vld [vmem:[#allocation6 + $0x104] sm:$0xf]  ;;  %v3765_v16 = vor.u32 %v4095_v3, %v3764_v0  ;;  %v2737_v0 = vor.u32 %v3834_v54, %v2734_v55  ;;  %v3668_v3 = vld [vmem:[#allocation6 + $0x7c0] sm:$0xf]  ;;  %v3214_v55 = vld [vmem:[#allocation6 + $0x448] sm:$0xf0] }
 0x101   : > { %2348 = vmatpush.bf16.msra.mxu3 %v3309_v7  ;;  %v3573_v7 = vor.u32 %v4047_v63, %v3572_v62  ;;  %v2809_v8 = vor.u32 %v3852_v4, %v2806_v13  ;;  %v4071_v4 = vld [vmem:[#allocation6 + $0x7d4] sm:$0xf0] }
 0x102   : > { %2310 = vmatpush.bf16.msra.mxu0 %v2709_v15  ;;  %v3001_v15 = vor.u32 %v3900_v5, %v2998_v6  ;;  %v2929_v6 = vor.u32 %v3882_v57, %v2926_v58  ;;  %v3406_v58 = vld [vmem:[#allocation6 + $0x5c8] sm:$0xf0] }
 0x103   : > { %2323 = vmatpush.bf16.msra.mxu1 %v2901_v21  ;;  %v2782_v21 = vld [vmem:[#allocation6 + $0xe8] sm:$0xf0] }
 0x104   : > { %2336 = vmatpush.bf16.msra.mxu2 %v3093_v22  ;;  %v3894_v22 = vld [vmem:[#allocation6 + $0x254] sm:$0xf]  ;;  %v2785_v28 = vor.u32 %v3846_v20, %v2782_v21  ;;  %v4017_v20 = vld [vmem:[#allocation6 + $0x624] sm:$0xf0]  ;;  %v3644_v21 = vld [vmem:[#allocation6 + $0x790] sm:$0xf] }
 0x105   : > { %2349 = vmatpush.bf16.msra.mxu3 %v3285_v26  ;;  %v2977_v37 = vor.u32 %v3894_v22, %v2974_v23  ;;  %v3669_v23 = vor.u32 %v4071_v4, %v3668_v3  ;;  %v3453_v31 = vor.u32 %v4017_v20, %v3452_v19  ;;  %v3766_v19 = vld [vmem:[#allocation6 + $0x898] sm:$0xf0] }
 0x106   : > { %2311 = vmatpush.bf16.msra.mxu0 %v2685_v38  ;;  %v2105_v26 = vpop.f32.mrf.mxu0  ;;  %v4083_v38 = vld [vmem:[#allocation6 + $0x834] sm:$0xf0] }
 0x107   : > { %2324 = vmatpush.bf16.msra.mxu1 %v2877_v41  ;;  %v2106_v30 = vadd.f32 %v2105_v26, %v4577_v1  ;;  %v2118_v32 = vpop.f32.mrf.mxu1  ;;  %v3888_v41 = vld [vmem:[#allocation6 + $0x224] sm:$0xf]  ;;  %v3717_v45 = vor.u32 %v4083_v38, %v3716_v29  ;;  %v3822_v26 = vld [vmem:[#allocation6 + $0x14] sm:$0xf] }
 0x108   : > { %2337 = vmatpush.bf16.msra.mxu2 %v3069_v42  ;;  %v2950_v42 = vld [vmem:[#allocation6 + $0x238] sm:$0xf0] }
 0x109   : > { %2350 = vmatpush.bf16.msra.mxu3 %v3261_v46  ;;  %2312 = vmatmul.bf16.vlgmr.msra.gmra.mxu0 %v4554_v34  ;;  %v2119_v43 = vadd.f32 %v2118_v32, %v2106_v30  ;;  %v2761_v46 = vor.u32 %v3840_v39, %v2758_v40  ;;  %v2953_v50 = vor.u32 %v3888_v41, %v2950_v42  ;;  %v3870_v32 = vld [vmem:[#allocation6 + $0x194] sm:$0xf]  ;;  %v3238_v39 = vld [vmem:[#allocation6 + $0x478] sm:$0xf0]  ;;  %v4008_v40 = vld [vmem:[#allocation6 + $0x5e4] sm:$0xf] }
 0x10a   : > { %2356 = vmatpush.bf16.msrb.mxu0 %v3621_v47  ;;  %2325 = vmatmul.bf16.vlgmr.msra.gmra.mxu1 %v4557_v36  ;;  %v3500_v47 = vld [vmem:[#allocation6 + $0x670] sm:$0xf]  ;;  %v2905_v30 = vor.u32 %v3876_v9, %v2902_v12  ;;  %v4056_v41 = vld [vmem:[#allocation6 + $0x764] sm:$0xf]  ;;  %v3622_v42 = vld [vmem:[#allocation6 + $0x778] sm:$0xf0] }
 0x10b   : > { %2369 = vmatpush.bf16.msrb.mxu1 %v3813_v48  ;;  %2338 = vmatmul.bf16.vlgmr.msra.gmra.mxu2 %v4565_v10  ;;  %v4029_v48 = vld [vmem:[#allocation6 + $0x684] sm:$0xf0]  ;;  %v3625_v54 = vor.u32 %v4056_v41, %v3622_v42  ;;  %v3574_v9 = vld [vmem:[#allocation6 + $0x718] sm:$0xf0]  ;;  %v4032_v42 = vld [vmem:[#allocation6 + $0x6a4] sm:$0xf] }
 0x10c   : > { %2382 = vmatpush.bf16.msrb.mxu2 %v2857_v49  ;;  %2351 = vmatmul.bf16.vlgmr.msra.gmra.mxu3 %v4571_v18  ;;  %v3692_v49 = vld [vmem:[#allocation6 + $0x7f0] sm:$0xf]  ;;  %v3334_v41 = vld [vmem:[#allocation6 + $0x538] sm:$0xf0] }
 0x10d   : > { %2395 = vmatpush.bf16.msrb.mxu3 %v3049_v53  ;;  %v4077_v53 = vld [vmem:[#allocation6 + $0x804] sm:$0xf0] }
 0x10e   : > { %2357 = vmatpush.bf16.msrb.mxu0 %v3597_v59  ;;  %v2131_v1 = vpop.f32.mrf.mxu2  ;;  %v2107_v62 = vpop.f32.mrf.mxu0  ;;  %v3693_v63 = vor.u32 %v4077_v53, %v3692_v49  ;;  %v3241_v49 = vor.u32 %v3960_v35, %v3238_v39  ;;  %v3142_v39 = vld [vmem:[#allocation6 + $0x3b8] sm:$0xf0] }
 0x10f   : > { %2370 = vmatpush.bf16.msrb.mxu1 %v3789_v60  ;;  %v2132_v51 = vadd.f32 %v2131_v1, %v2119_v43  ;;  %v2144_v52 = vpop.f32.mrf.mxu3  ;;  %v3501_v60 = vor.u32 %v4029_v48, %v3500_v47  ;;  %v2120_v13 = vpop.f32.mrf.mxu1  ;;  %v3430_v43 = vld [vmem:[#allocation6 + $0x5f8] sm:$0xf0]  ;;  %v4104_v1 = vld [vmem:[#allocation6 + $0x8e4] sm:$0xf]  ;;  %v2881_v48 = vor.u32 %v3870_v32, %v2878_v33  ;;  %v4098_v62 = vld [vmem:[#allocation6 + $0x8b4] sm:$0xf] }
 0x110   : > { %2383 = vmatpush.bf16.msrb.mxu2 %v2833_v61  ;;  %v3476_v61 = vld [vmem:[#allocation6 + $0x640] sm:$0xf]  ;;  %v3814_v47 = vld [vmem:[#allocation6 + $0x8f8] sm:$0xf0]  ;;  %v3433_v53 = vor.u32 %v4008_v40, %v3430_v43  ;;  %v4086_v32 = vld [vmem:[#allocation6 + $0x854] sm:$0xf] }
 0x111   : > { %2396 = vmatpush.bf16.msrb.mxu3 %v3025_v2  ;;  %v2145_v59 = vadd.f32 %v2144_v52, %v2132_v51  ;;  %v4023_v2 = vld [vmem:[#allocation6 + $0x654] sm:$0xf0]  ;;  %v3817_v57 = vor.u32 %v4104_v1, %v3814_v47  ;;  %v3984_v40 = vld [vmem:[#allocation6 + $0x524] sm:$0xf] }
 0x112   : > { %2358 = vmatpush.bf16.msrb.mxu0 %v3573_v7  ;;  %v3828_v7 = vld [vmem:[#allocation6 + $0x44] sm:$0xf]  ;;  %v3337_v47 = vor.u32 %v3984_v40, %v3334_v41 }
 0x113   : > { %2371 = vmatpush.bf16.msrb.mxu1 %v3765_v16  ;;  %v2469_v5 = vsel %vm2461_vm0, %v2145_v59, 0.0  ;;  %v2710_v16 = vld [vmem:[#allocation6 + $0x58] sm:$0xf0]  ;;  %v4050_v59 = vld [vmem:[#allocation6 + $0x734] sm:$0xf] }
 0x114   : > { %2384 = vmatpush.bf16.msrb.mxu2 %v2809_v8  ;;  %v2465_v8 = vrot.slane %v2464_v56, 2  ;;  %v2470_v17 = vrot.slane %v2469_v5, 4  ;;  %v2713_v24 = vor.u32 %v3828_v7, %v2710_v16  ;;  %v3996_v7 = vld [vmem:[#allocation6 + $0x584] sm:$0xf] }
 0x115   : > { %2397 = vmatpush.bf16.msrb.mxu3 %v3001_v15  ;;  %v3477_v15 = vor.u32 %v4023_v2, %v3476_v61  ;;  %v3948_v2 = vld [vmem:[#allocation6 + $0x404] sm:$0xf] }
 0x116   : > { %2359 = vmatpush.bf16.msrb.mxu0 %v3549_v25  ;;  %v2471_v22 = vadd.f32 %v2470_v17, %v2469_v5  ;;  %v4065_v25 = vld [vmem:[#allocation6 + $0x7a4] sm:$0xf0]  ;;  %v4044_v17 = vld [vmem:[#allocation6 + $0x704] sm:$0xf] }
 0x117   : > { %2372 = vmatpush.bf16.msrb.mxu1 %v3741_v27  ;;  %v2686_v27 = vld [vmem:[#allocation6 + $0x28] sm:$0xf0]  ;;  %v2146_v29 = vpop.f32.mrf.mxu3 }
 0x118   : > { %2385 = vmatpush.bf16.msrb.mxu2 %v2785_v28  ;;  %v2133_v28 = vpop.f32.mrf.mxu2  ;;  %v2472_v38 = vrot.slane %v2471_v22, 2 }
 0x119   : > { %2398 = vmatpush.bf16.msrb.mxu3 %v2977_v37  ;;  %v2466_v37 = vadd.f32 %v2465_v8, %v2464_v56  ;;  %v4002_v56 = vld [vmem:[#allocation6 + $0x5b4] sm:$0xf]  ;;  %v3382_v8 = vld [vmem:[#allocation6 + $0x598] sm:$0xf0] }
 0x11a   : > { %2360 = vmatpush.bf16.msrb.mxu0 %v3525_v44  ;;  %v2473_v44 = vadd.f32 %v2472_v38, %v2471_v22  ;;  %v3409_v13 = vor.u32 %v4002_v56, %v3406_v58  ;;  %v3577_v22 = vor.u32 %v4044_v17, %v3574_v9  ;;  %v4038_v28 = vld [vmem:[#allocation6 + $0x6d4] sm:$0xf]  ;;  %v3936_v38 = vld [vmem:[#allocation6 + $0x3a4] sm:$0xf]  ;;  %v3694_v58 = vld [vmem:[#allocation6 + $0x808] sm:$0xf0] }
 0x11b   : > { %2373 = vmatpush.bf16.msrb.mxu1 %v3717_v45  ;;  %v3645_v45 = vor.u32 %v4065_v25, %v3644_v21  ;;  %v2467_v51 = vrot.slane %v2466_v37, 1  ;;  %v3385_v21 = vor.u32 %v3996_v7, %v3382_v8  ;;  %v3990_v25 = vld [vmem:[#allocation6 + $0x554] sm:$0xf]  ;;  %v3145_v1 = vor.u32 %v3936_v38, %v3142_v39  ;;  %v3286_v7 = vld [vmem:[#allocation6 + $0x4d8] sm:$0xf0] }
 0x11c   : > { %2386 = vmatpush.bf16.msrb.mxu2 %v2761_v46  ;;  %v2689_v46 = vor.u32 %v3822_v26, %v2686_v27  ;;  %v2474_v52 = vrot.slane %v2473_v44, 1  ;;  %v3358_v27 = vld [vmem:[#allocation6 + $0x568] sm:$0xf0]  ;;  %v3478_v8 = vld [vmem:[#allocation6 + $0x658] sm:$0xf0] }
 0x11d   : > { %2399 = vmatpush.bf16.msrb.mxu3 %v2953_v50  ;;  %v3954_v50 = vld [vmem:[#allocation6 + $0x434] sm:$0xf]  ;;  %v2468_v3 = vadd.f32 %v2467_v51, %v2466_v37  ;;  %v4068_v17 = vld [vmem:[#allocation6 + $0x7c4] sm:$0xf]  ;;  %v3670_v9 = vld [vmem:[#allocation6 + $0x7d8] sm:$0xf0] }
 0x11e   : > { %2361 = vmatpush.bf16.msrb.mxu0 %v3501_v60  ;;  %v3598_v60 = vld [vmem:[#allocation6 + $0x748] sm:$0xf0]  ;;  %v2475_v61 = vadd.f32 %v2474_v52, %v2473_v44  ;;  %v3526_v44 = vld [vmem:[#allocation6 + $0x6b8] sm:$0xf0]  ;;  %v3978_v51 = vld [vmem:[#allocation6 + $0x4f4] sm:$0xf] }
 0x11f   : > { %2374 = vmatpush.bf16.msrb.mxu1 %v3693_v63  ;;  %v3790_v63 = vld [vmem:[#allocation6 + $0x8c8] sm:$0xf0]  ;;  %v3601_v5 = vor.u32 %v4050_v59, %v3598_v60 }
 0x120   : > { %2387 = vmatpush.bf16.msrb.mxu2 %v2737_v0  ;;  %v3217_v0 = vor.u32 %v3954_v50, %v3214_v55  ;;  %v2510_v4 = vrot.slane %v2475_v61, 7  ;;  %v3793_v16 = vor.u32 %v4098_v62, %v3790_v63  ;;  %v3118_v50 = vld [vmem:[#allocation6 + $0x388] sm:$0xf0] }
 0x121   : > { %2400 = vmatpush.bf16.msrb.mxu3 %v2929_v6  ;;  %v3190_v6 = vld [vmem:[#allocation6 + $0x418] sm:$0xf0]  ;;  %v3502_v55 = vld [vmem:[#allocation6 + $0x688] sm:$0xf0] }
 0x122   : > { %2362 = vmatpush.bf16.msrb.mxu0 %v3477_v15  ;;  %v4589_v12 = vsel %vm2515_vm1, %v2468_v3, %v2510_v4  ;;  %v4092_v15 = vld [vmem:[#allocation6 + $0x884] sm:$0xf]  ;;  %v3193_v20 = vor.u32 %v3948_v2, %v3190_v6  ;;  %v3094_v4 = vld [vmem:[#allocation6 + $0x358] sm:$0xf0] }
 0x123   : > { %2375 = vmatpush.bf16.msrb.mxu1 %v3669_v23  ;;  %v3942_v23 = vld [vmem:[#allocation6 + $0x3d4] sm:$0xf]  ;;  %v3769_v26 = vor.u32 %v4092_v15, %v3766_v19  ;;  %v3924_v3 = vld [vmem:[#allocation6 + $0x344] sm:$0xf] }
 0x124   : > { %2388 = vmatpush.bf16.msrb.mxu2 %v2713_v24  ;;  %v3166_v24 = vld [vmem:[#allocation6 + $0x3e8] sm:$0xf0]  ;;  %v3097_v15 = vor.u32 %v3924_v3, %v3094_v4 }
 0x125   : > { %2401 = vmatpush.bf16.msrb.mxu3 %v2905_v30  ;;  %v3550_v30 = vld [vmem:[#allocation6 + $0x6e8] sm:$0xf0]  ;;  %v3169_v35 = vor.u32 %v3942_v23, %v3166_v24  ;;  %v3966_v23 = vld [vmem:[#allocation6 + $0x494] sm:$0xf]  ;;  %v3673_v24 = vor.u32 %v4068_v17, %v3670_v9 }
 0x126   : > { %2363 = vmatpush.bf16.msrb.mxu0 %v3453_v31  ;;  %v2157_v33 = vpop.f32.mrf.mxu0  ;;  %v3553_v37 = vor.u32 %v4038_v28, %v3550_v30  ;;  %v4062_v30 = vld [vmem:[#allocation6 + $0x794] sm:$0xf] }
 0x127   : > { %2376 = vmatpush.bf16.msrb.mxu1 %v3645_v45  ;;  %v2170_v29 = vpop.f32.mrf.mxu1  ;;  %v4080_v45 = vld [vmem:[#allocation6 + $0x824] sm:$0xf] }
 0x128   : > { %2389 = vmatpush.bf16.msrb.mxu2 %v2689_v46  ;;  %v2171_v31 = vadd.f32 %v2170_v29, %v2157_v33  ;;  %v3718_v46 = vld [vmem:[#allocation6 + $0x838] sm:$0xf0] }
 0x129   : > { %2402 = vmatpush.bf16.msrb.mxu3 %v2881_v48  ;;  %2364 = vmatmul.bf16.vlgmr.msrb.gmra.mxu0 %v4562_v14  ;;  %v3529_v48 = vor.u32 %v4032_v42, %v3526_v44  ;;  %v3721_v52 = vor.u32 %v4080_v45, %v3718_v46 }
 0x12a   : > { %2408 = vmatpush.bf16.msra.mxu0 %v3241_v49  ;;  %2377 = vmatmul.bf16.vlgmr.msrb.gmra.mxu1 %v4568_v11  ;;  %v3930_v49 = vld [vmem:[#allocation6 + $0x374] sm:$0xf] }
 0x12b   : > { %2421 = vmatpush.bf16.msra.mxu1 %v3433_v53  ;;  %2390 = vmatmul.bf16.vlgmr.msrb.gmra.mxu2 %v4554_v34  ;;  %v3742_v34 = vld [vmem:[#allocation6 + $0x868] sm:$0xf0]  ;;  %v3121_v62 = vor.u32 %v3930_v49, %v3118_v50 }
 0x12c   : > { %2434 = vmatpush.bf16.msra.mxu2 %v3625_v54  ;;  %2403 = vmatmul.bf16.vlgmr.msrb.gmra.mxu3 %v4557_v36  ;;  %v3361_v36 = vor.u32 %v3990_v25, %v3358_v27  ;;  %v3745_v43 = vor.u32 %v4086_v32, %v3742_v34  ;;  %v3310_v53 = vld [vmem:[#allocation6 + $0x508] sm:$0xf0]  ;;  %v4026_v54 = vld [vmem:[#allocation6 + $0x674] sm:$0xf] }
 0x12d   : > { %2447 = vmatpush.bf16.msra.mxu3 %v3817_v57  ;;  %v4074_v57 = vld [vmem:[#allocation6 + $0x7f4] sm:$0xf]  ;;  %v3505_v2 = vor.u32 %v4026_v54, %v3502_v55  ;;  %v3262_v25 = vld [vmem:[#allocation6 + $0x4a8] sm:$0xf0] }
 0x12e   : > { %2409 = vmatpush.bf16.msra.mxu0 %v3217_v0  ;;  %v2183_v56 = vpop.f32.mrf.mxu2  ;;  %v2159_v59 = vpop.f32.mrf.mxu0  ;;  %v3313_v0 = vor.u32 %v3978_v51, %v3310_v53  ;;  %v3697_v6 = vor.u32 %v4074_v57, %v3694_v58  ;;  %v3454_v27 = vld [vmem:[#allocation6 + $0x628] sm:$0xf0] }
 0x12f   : > { %2422 = vmatpush.bf16.msra.mxu1 %v3409_v13  ;;  %v2184_v60 = vadd.f32 %v2183_v56, %v2171_v31  ;;  %v2196_v61 = vpop.f32.mrf.mxu3  ;;  %v2172_v63 = vpop.f32.mrf.mxu1  ;;  %v3972_v13 = vld [vmem:[#allocation6 + $0x4c4] sm:$0xf]  ;;  %v3646_v32 = vld [vmem:[#allocation6 + $0x7a8] sm:$0xf0] }
 0x130   : > { %2435 = vmatpush.bf16.msra.mxu2 %v3601_v5  ;;  %v3289_v19 = vor.u32 %v3972_v13, %v3286_v7 }
 0x131   : > { %2448 = vmatpush.bf16.msra.mxu3 %v3793_v16  ;;  %v2197_v5 = vadd.f32 %v2196_v61, %v2184_v60  ;;  %v4020_v16 = vld [vmem:[#allocation6 + $0x644] sm:$0xf] }
 0x132   : > { %2410 = vmatpush.bf16.msra.mxu0 %v3193_v20  ;;  %v3481_v20 = vor.u32 %v4020_v16, %v3478_v8 }
 0x133   : > { %2423 = vmatpush.bf16.msra.mxu1 %v3385_v21  ;;  %v3918_v21 = vld [vmem:[#allocation6 + $0x314] sm:$0xf] }
 0x134   : > { %2436 = vmatpush.bf16.msra.mxu2 %v3577_v22  ;;  %v3070_v22 = vld [vmem:[#allocation6 + $0x328] sm:$0xf0] }
 0x135   : > { %2449 = vmatpush.bf16.msra.mxu3 %v3769_v26  ;;  %v4014_v26 = vld [vmem:[#allocation6 + $0x614] sm:$0xf]  ;;  %v3073_v33 = vor.u32 %v3918_v21, %v3070_v22 }
 0x136   : > { %2411 = vmatpush.bf16.msra.mxu0 %v3169_v35  ;;  %v2185_v28 = vpop.f32.mrf.mxu2  ;;  %v3265_v35 = vor.u32 %v3966_v23, %v3262_v25  ;;  %v3457_v29 = vor.u32 %v4014_v26, %v3454_v27  ;;  %v4387_v26 = vmov 0.0  }
 0x137   : > { %2424 = vmatpush.bf16.msra.mxu1 %v3361_v36  ;;  %v2198_v34 = vpop.f32.mrf.mxu3  ;;  %v3649_v36 = vor.u32 %v4062_v30, %v3646_v32 }
 0x138   : > { %2437 = vmatpush.bf16.msra.mxu2 %v3553_v37 }
 0x139   : > { %2450 = vmatpush.bf16.msra.mxu3 %v3745_v43 }
 0x13a   : > { %2412 = vmatpush.bf16.msra.mxu0 %v3145_v1 }
 0x13b   : > { %2425 = vmatpush.bf16.msra.mxu1 %v3337_v47 }
 0x13c   : > { %2438 = vmatpush.bf16.msra.mxu2 %v3529_v48 }
 0x13d   : > { %2451 = vmatpush.bf16.msra.mxu3 %v3721_v52 }
 0x13e   : > { %2413 = vmatpush.bf16.msra.mxu0 %v3121_v62 }
 0x13f   : > { %2426 = vmatpush.bf16.msra.mxu1 %v3313_v0 }
 0x140   : > { %2439 = vmatpush.bf16.msra.mxu2 %v3505_v2 }
 0x141   : > { %2452 = vmatpush.bf16.msra.mxu3 %v3697_v6 }
 0x142   : > { %2414 = vmatpush.bf16.msra.mxu0 %v3097_v15 }
 0x143   : > { %2427 = vmatpush.bf16.msra.mxu1 %v3289_v19 }
 0x144   : > { %2440 = vmatpush.bf16.msra.mxu2 %v3481_v20 }
 0x145   : > { %2453 = vmatpush.bf16.msra.mxu3 %v3673_v24  ;;  %v240_v24 = vlaneseq }
 0x146   : > { %2415 = vmatpush.bf16.msra.mxu0 %v3073_v33  ;;  %v2209_v37 = vpop.f32.mrf.mxu0 }
 0x147   : > { %2428 = vmatpush.bf16.msra.mxu1 %v3265_v35  ;;  %v2210_v38 = vadd.f32 %v2209_v37, %v2197_v5  ;;  %v2222_v39 = vpop.f32.mrf.mxu1  ;;  %vm4602_vm3 = vcmp.lt.s32.totalorder %v240_v24, 768 }
 0x148   : > { %2441 = vmatpush.bf16.msra.mxu2 %v3457_v29  ;;  %244 = vst.msk [vmem:[#allocation2] sm:$0x3f] %vm4602_vm3, %v4387_v26 }
 0x149   : > { %2454 = vmatpush.bf16.msra.mxu3 %v3649_v36  ;;  %2416 = vmatmul.bf16.vlgmr.msra.gmra.mxu0 %v4565_v10  ;;  %v2223_v40 = vadd.f32 %v2222_v39, %v2210_v38 }
 0x14a   : > { %2429 = vmatmul.bf16.vlgmr.msra.gmra.mxu1 %v4571_v18 }
 0x14b   : > { %2442 = vmatmul.bf16.vlgmr.msra.gmra.mxu2 %v4562_v14  ;;  %v2476_v31 = vsel %vm2461_vm0, %v2223_v40, 0.0 }
 0x14c   : > { %2455 = vmatmul.bf16.vlgmr.msra.gmra.mxu3 %v4568_v11  ;;  %v2477_v43 = vrot.slane %v2476_v31, 4 }
 0x14e   : > { %v2235_v41 = vpop.f32.mrf.mxu2  ;;  %v2478_v42 = vadd.f32 %v2477_v43, %v2476_v31  ;;  %v2211_v45 = vpop.f32.mrf.mxu0 }
 0x14f   : > { %v2248_v44 = vpop.f32.mrf.mxu3  ;;  %v2224_v1 = vpop.f32.mrf.mxu1 }
 0x150   : > { %v2249_v46 = vadd.f32 %v2248_v44, %v2235_v41  ;;  %v2479_v10 = vrot.slane %v2478_v42, 2 }
 0x152   : > { %v2480_v47 = vadd.f32 %v2479_v10, %v2478_v42 }
 0x154   : > { %v2481_v18 = vrot.slane %v2480_v47, 1 }
 0x156   : > { %v2237_v48 = vpop.f32.mrf.mxu2  ;;  %v2482_v14 = vadd.f32 %v2481_v18, %v2480_v47 }
 0x157   : > { %v2250_v49 = vpop.f32.mrf.mxu3 }
 0x158   : > { %v2511_v11 = vrot.slane %v2482_v14, 6 }
 0x15a   : > { %v4600_v50 = vsel %vm2517_vm2, %v4589_v12, %v2511_v11 }
 0x166   : > { %v2261_v51 = vpop.f32.mrf.mxu0 }
 0x167   : > { %v2262_v52 = vadd.f32 %v2261_v51, %v2249_v46  ;;  %v2274_v53 = vpop.f32.mrf.mxu1 }
 0x169   : > { %v2275_v54 = vadd.f32 %v2274_v53, %v2262_v52 }
 0x16e   : > { %v2287_v55 = vpop.f32.mrf.mxu2  ;;  %v2263_v59 = vpop.f32.mrf.mxu0 }
 0x16f   : > { %v2288_v56 = vadd.f32 %v2287_v55, %v2275_v54  ;;  %v2300_v57 = vpop.f32.mrf.mxu3  ;;  %v2276_v60 = vpop.f32.mrf.mxu1 }
 0x171   : > { %v2301_v58 = vadd.f32 %v2300_v57, %v2288_v56 }
 0x173   : > { %v2483_v30 = vsel %vm2461_vm0, %v2301_v58, 0.0 }
 0x174   : > { %v2484_v34 = vrot.slane %v2483_v30, 4 }
 0x176   : > { %v2289_v61 = vpop.f32.mrf.mxu2  ;;  %v2485_v38 = vadd.f32 %v2484_v34, %v2483_v30 }
 0x177   : > { %v2302_v62 = vpop.f32.mrf.mxu3 }
 0x178   : > { %v2486_v43 = vrot.slane %v2485_v38, 2  ;;  %v2460_v62 = vld [vmem:[#allocation2] sm:$0x3f] }
 0x17a   : > { %v2487_v10 = vadd.f32 %v2486_v43, %v2485_v38 }
 0x17c   : > { %v2488_v11 = vrot.slane %v2487_v10, 1 }
 0x17e   : > { %v2489_v55 = vadd.f32 %v2488_v11, %v2487_v10 }
 0x180   : > { %v2512_v59 = vrot.slane %v2489_v55, 5 }
 0x186   : > { %v2313_v63 = vpop.f32.mrf.mxu0 }
 0x187   : > { %v2326_v0 = vpop.f32.mrf.mxu1 }
 0x188   : > { %v2327_v16 = vadd.f32 %v2326_v0, %v2313_v63 }
 0x18e   : > { %v2339_v2 = vpop.f32.mrf.mxu2  ;;  %v2315_v3 = vpop.f32.mrf.mxu0 }
 0x18f   : > { %v2352_v4 = vpop.f32.mrf.mxu3  ;;  %v2328_v13 = vpop.f32.mrf.mxu1  ;;  %v2340_v17 = vadd.f32 %v2339_v2, %v2327_v16 }
 0x191   : > { %v2353_v20 = vadd.f32 %v2352_v4, %v2340_v17  ;;  %v2537_v4 = vld [vmem:[#allocation8] sm:$0x3f] }
 0x196   : > { %v2341_v12 = vpop.f32.mrf.mxu2 }
 0x197   : > { %v2354_v5 = vpop.f32.mrf.mxu3 }
 0x1a6   : > { %v2365_v6 = vpop.f32.mrf.mxu0 }
 0x1a7   : > { %v2378_v7 = vpop.f32.mrf.mxu1  ;;  %v2366_v22 = vadd.f32 %v2365_v6, %v2353_v20 }
 0x1a9   : > { %v2379_v27 = vadd.f32 %v2378_v7, %v2366_v22 }
 0x1ab   : > { %v2490_v28 = vsel %vm2461_vm0, %v2379_v27, 0.0 }
 0x1ac   : > { %v2491_v32 = vrot.slane %v2490_v28, 4 }
 0x1ae   : > { %v2391_v8 = vpop.f32.mrf.mxu2  ;;  %v2367_v15 = vpop.f32.mrf.mxu0  ;;  %v2492_v36 = vadd.f32 %v2491_v32, %v2490_v28 }
 0x1af   : > { %v2404_v9 = vpop.f32.mrf.mxu3  ;;  %v2380_v19 = vpop.f32.mrf.mxu1 }
 0x1b0   : > { %v2405_v33 = vadd.f32 %v2404_v9, %v2391_v8  ;;  %v2493_v39 = vrot.slane %v2492_v36, 2 }
 0x1b2   : > { %v2494_v46 = vadd.f32 %v2493_v39, %v2492_v36 }
 0x1b4   : > { %v2495_v48 = vrot.slane %v2494_v46, 1 }
 0x1b6   : > { %v2393_v21 = vpop.f32.mrf.mxu2  ;;  %v2496_v53 = vadd.f32 %v2495_v48, %v2494_v46 }
 0x1b7   : > { %v2406_v23 = vpop.f32.mrf.mxu3 }
 0x1b8   : > { %v2513_v57 = vrot.slane %v2496_v53, 4 }
 0x1ba   : > { %v2520_v61 = vsel %vm2519_vm4, %v2512_v59, %v2513_v57 }
 0x1c6   : > { %v2417_v35 = vpop.f32.mrf.mxu0 }
 0x1c7   : > { %v2430_v29 = vpop.f32.mrf.mxu1  ;;  %v2418_v37 = vadd.f32 %v2417_v35, %v2405_v33 }
 0x1c9   : > { %v2431_v40 = vadd.f32 %v2430_v29, %v2418_v37 }
 0x1ce   : > { %v2443_v31 = vpop.f32.mrf.mxu2  ;;  %v2419_v44 = vpop.f32.mrf.mxu0 }
 0x1cf   : > { %v2444_v41 = vadd.f32 %v2443_v31, %v2431_v40  ;;  %v2456_v42 = vpop.f32.mrf.mxu3  ;;  %v2432_v45 = vpop.f32.mrf.mxu1 }
 0x1d1   : > { %v2457_v1 = vadd.f32 %v2456_v42, %v2444_v41 }
 0x1d3   : > { %v2497_v47 = vsel %vm2461_vm0, %v2457_v1, 0.0 }
 0x1d4   : > { %v2498_v18 = vrot.slane %v2497_v47, 4 }
 0x1d6   : > { %v2499_v14 = vadd.f32 %v2498_v18, %v2497_v47  ;;  %v2445_v49 = vpop.f32.mrf.mxu2 }
 0x1d7   : > { %v2458_v51 = vpop.f32.mrf.mxu3 }
 0x1d8   : > { %v2500_v52 = vrot.slane %v2499_v14, 2 }
 0x1da   : > { %v2501_v54 = vadd.f32 %v2500_v52, %v2499_v14 }
 0x1dc   : > { %v2502_v56 = vrot.slane %v2501_v54, 1 }
 0x1de   : > { %v2503_v58 = vadd.f32 %v2502_v56, %v2501_v54 }
 0x1e0   : > { %v2514_v60 = vrot.slane %v2503_v58, 3 }
 0x1e2   : > { %v2522_v63 = vsel %vm2521_vm5, %v2520_v61, %v2514_v60 }
 0x1e3   : > { %v2524_v0 = vsel %vm2523_vm6, %v4600_v50, %v2522_v63 }
 0x1e4   : > { %v2526_v2 = vadd.f32 %v2524_v0, %v2460_v62 }
 0x1e6   : > { %2531 = vst.msk [vmem:[#allocation2] sm:$0x3f] %vm4602_vm3, %v2526_v2 }
 0x1ed   : > { %v2535_v3 = vld [vmem:[#allocation2] sm:$0x3f] }
 0x1ee   : > { %v2536_v13 = vmul.f32 0.25, %v2535_v3 }
 0x1f0   : > { %v2538_v12 = vadd.f32 %v2537_v4, %v2536_v13 }
 0x1f2   : > { %2539 = vst.msk [vmem:[%s235_s25] sm:$0x3f] %vm4602_vm3, %v2538_v12 }
 0x1f3   : > { %4322 = shalt.err (!%p4319_p13)
}
 0x1f4   : > { %4123 = dma.vmem_to_hbm [thread:$0]  (%p4486_p2), %s2554_s26, 96, %s2556_s27, %s2541_s28  }
 0x1f5 PF: > { %s2567_s6 = sand.u32 1, %s4361_s12   ;;  %p4137_p0 = pnand %p2661_p6, %p4493_p5 }
 0x1f6   : > { %s2568_s9 = scalar_lea.sflag [#allocation5], %s2567_s6 }
 0x1f7   : > { %p4138_p4 = pneg %p4137_p0 }
 0x1f9   : > { %4356 = dma.done.wait (%p4138_p4), %s2568_s9, 96  }
 0x1fa   : > { %4358 = vsyncadd (%p4138_p4), %s2568_s9, 4294967200  ;;  %s20_s17 = sadd.s32 1, %s4381_s17   ;;  %s4667_s12 = smov %s4365_s13 }
 0x1fb   : > { %p17_p7 = scmp.ge.s32.totalorder %s20_s17, 4   ;;  %s4668_s13 = smov %s4369_s14 }
 0x1fc   : > { %s4669_s14 = smov %s4491_s21  ;;  %s4670_s15 = smov %s4377_s16 }
 0x1fd   : > { %s4671_s16 = smov %s4673_s7  ;;  %19 = sbr.rel (!%p17_p7) target bundleno = 7 (0x7), region = 94 }
 0x202   :  { %2574 = vsyncpa [#allocation4], 1 }
 0x203   :  { %2576 = vsyncpa [#allocation4 + $0x1], 1 }
 0x204   :  { %2577 = vsyncpa [#allocation7], 1 }
 0x205   :  { %2578 = vsyncpa [#allocation5], 1 }
 0x206   :  { %2580 = vsyncpa [#allocation5 + $0x1], 1 }

</bundles_post_ra>
